<compile_context>
chip_gen: v5e
topology: v5e:2x2
jax: 0.10.0
libtpu: 0.0.40
codegen_flags: <defaults>
</compile_context>

<pallas_src>
import functools
import math

import jax
import jax.numpy as jnp
from jax.experimental import pallas as pl
from jax.experimental.pallas import tpu as pltpu

# ----------------------------- model config ---------------------------------
VOCAB_SIZE = 100
VOCAB_PAD = 128          # vocab padded to a full 128-lane width for the one-hot matmul
MAX_LEN = 8              # sequence length
D_MODEL = 32
NHEAD = 4
HEAD_DIM = D_MODEL // NHEAD
DIM_FF = 64
NUM_LAYERS = 2
BATCH = 2
LN_EPS = 1e-5
VEC_W = max(3 * D_MODEL, DIM_FF)   # lane width of the packed per-layer vector slab


# --------------------- single fused whole-network kernel --------------------
def _net_kernel(tok_ref, emb_ref, pos_ref, bias_ref,
                wqkv_ref, wo_ref, w1_ref, w2_ref, vec_ref,
                fcw_ref, fcb_ref, out_ref, *,
                batch, seq, d_model, nhead, dim_ff, num_layers):
    f32 = jnp.float32
    bs = batch * seq
    hd = d_model // nhead
    scale = 1.0 / math.sqrt(hd)

    # ---- fused token embedding (one-hot matmul) + positional embedding -----
    tok = tok_ref[...]                                            # (BS, 1) int32
    vpad = emb_ref.shape[0]
    onehot = (jax.lax.broadcasted_iota(jnp.int32, (bs, vpad), 1) == tok).astype(f32)
    x = jnp.dot(onehot, emb_ref[...], preferred_element_type=f32)  # (BS, D)
    x = x + jnp.concatenate([pos_ref[...]] * batch, axis=0)        # + pos (tiled over batch)

    # block-diagonal additive mask: 0 within a batch element, -1e30 across
    attn_bias = bias_ref[...][None]                                # (1, BS, BS)

    def layer_norm(v, g, b):
        mu = jnp.mean(v, axis=-1, keepdims=True)
        var = jnp.mean((v - mu) ** 2, axis=-1, keepdims=True)
        return (v - mu) * jax.lax.rsqrt(var + LN_EPS) * g + b

    # ------------------------ encoder stack (unrolled) ----------------------
    for l in range(num_layers):
        wqkvT = wqkv_ref[l]                                        # (D, 3D)  = in_proj_weight.T
        wo3 = wo_ref[l * nhead:(l + 1) * nhead]                    # (H, HD, D) = out_proj.weight.T split by head
        w1T = w1_ref[l]                                            # (D, F)   = linear1.weight.T
        w2T = w2_ref[l]                                            # (F, D)   = linear2.weight.T
        vec = vec_ref[l]                                           # (4, VEC_W) packed vectors
        bqkv = vec[0:1, 0:3 * d_model]
        bo = vec[1:2, 0:d_model]
        g1 = vec[1:2, d_model:2 * d_model]
        be1 = vec[1:2, 2 * d_model:3 * d_model]
        b1 = vec[2:3, 0:dim_ff]
        b2 = vec[3:4, 0:d_model]
        g2 = vec[3:4, d_model:2 * d_model]
        be2 = vec[3:4, 2 * d_model:3 * d_model]

        # QKV projection for the whole flattened batch
        qkv = jnp.dot(x, wqkvT, preferred_element_type=f32) + bqkv  # (BS, 3D)

        def split_heads(base):                                      # -> (H, BS, HD)
            return jnp.stack(
                [qkv[:, base + h * hd: base + (h + 1) * hd] for h in range(nhead)],
                axis=0)

        q3 = split_heads(0)
        k3 = split_heads(d_model)
        v3 = split_heads(2 * d_model)

        # head-batched attention with block-diagonal mask over the flat batch
        s = jnp.einsum('hqd,hkd->hqk', q3, k3,
                       preferred_element_type=f32) * scale + attn_bias  # (H, BS, BS)
        s = s - jnp.max(s, axis=-1, keepdims=True)
        p = jnp.exp(s)
        p = p * pl.reciprocal(jnp.sum(p, axis=-1, keepdims=True), approx=True)
        ctx3 = jnp.einsum('hqk,hkd->hqd', p, v3,
                          preferred_element_type=f32)               # (H, BS, HD)

        # out-projection fused with the head merge: sum_h ctx_h @ WoT_h
        attn = jnp.sum(jnp.einsum('hsd,hdo->hso', ctx3, wo3,
                                  preferred_element_type=f32), axis=0) + bo  # (BS, D)

        # post-norm residual 1
        y = layer_norm(x + attn, g1, be1)

        # feed-forward: linear1 -> relu -> linear2
        hmid = jnp.maximum(jnp.dot(y, w1T, preferred_element_type=f32) + b1, 0.0)
        z = jnp.dot(hmid, w2T, preferred_element_type=f32) + b2

        # post-norm residual 2
        x = layer_norm(y + z, g2, be2)

    # ---------- AdaptiveMaxPool1d(1) over the sequence + fc_out head ---------
    pooled = jnp.concatenate(
        [jnp.max(x[b * seq:(b + 1) * seq, :], axis=0, keepdims=True)
         for b in range(batch)], axis=0)                            # (B, D)
    out_ref[...] = jnp.dot(pooled, fcw_ref[...],
                           preferred_element_type=f32) + fcb_ref[...]


# ------------------------------ parameters -----------------------------------
def init_params(key):
    """Parameters in the native PyTorch layout (Embedding / in_proj / etc.)."""
    def nrm(k, shape, s=0.02):
        return (s * jax.random.normal(k, shape)).astype(jnp.float32)

    keys = jax.random.split(key, 4 + NUM_LAYERS)
    params = {
        "emb": nrm(keys[0], (VOCAB_SIZE, D_MODEL), 1.0),
        "pos_emb": nrm(keys[1], (MAX_LEN, D_MODEL), 1.0),
        "fc_w": nrm(keys[2], (1, D_MODEL)),
        "fc_b": jnp.zeros((1, 1), jnp.float32),
        "layers": [],
    }
    for li in range(NUM_LAYERS):
        lk = jax.random.split(keys[4 + li], 8)
        params["layers"].append({
            "wqkv": nrm(lk[0], (3 * D_MODEL, D_MODEL)),   # in_proj_weight
            "bqkv": jnp.zeros((1, 3 * D_MODEL), jnp.float32),
            "wo":   nrm(lk[1], (D_MODEL, D_MODEL)),       # out_proj.weight
            "bo":   jnp.zeros((1, D_MODEL), jnp.float32),
            "g1":   jnp.ones((1, D_MODEL), jnp.float32),
            "be1":  jnp.zeros((1, D_MODEL), jnp.float32),
            "w1":   nrm(lk[2], (DIM_FF, D_MODEL)),        # linear1.weight
            "b1":   jnp.zeros((1, DIM_FF), jnp.float32),
            "w2":   nrm(lk[3], (D_MODEL, DIM_FF)),        # linear2.weight
            "b2":   jnp.zeros((1, D_MODEL), jnp.float32),
            "g2":   jnp.ones((1, D_MODEL), jnp.float32),
            "be2":  jnp.zeros((1, D_MODEL), jnp.float32),
        })
    return params


def pack_params(params):
    """One-time host-side prep: pre-transpose matrices, split out_proj by head,
    pack all per-layer vectors into one (4, VEC_W) slab, stack layers."""
    D, F, H, HD = D_MODEL, DIM_FF, NHEAD, HEAD_DIM

    emb_pad = jnp.zeros((VOCAB_PAD, D), jnp.float32).at[:VOCAB_SIZE].set(params["emb"])

    def row(*parts):
        v = jnp.concatenate([p.reshape(-1) for p in parts])
        return jnp.pad(v, (0, VEC_W - v.shape[0]))

    wqkv_all, wo_all, w1_all, w2_all, vec_all = [], [], [], [], []
    for lp in params["layers"]:
        wqkv_all.append(lp["wqkv"].T)                    # (D, 3D)
        wo_all.append(lp["wo"].T.reshape(H, HD, D))      # (H, HD, D)  rows of Wo.T, head-contiguous
        w1_all.append(lp["w1"].T)                        # (D, F)
        w2_all.append(lp["w2"].T)                        # (F, D)
        vec_all.append(jnp.stack([
            row(lp["bqkv"]),
            row(lp["bo"], lp["g1"], lp["be1"]),
            row(lp["b1"]),
            row(lp["b2"], lp["g2"], lp["be2"]),
        ]))                                              # (4, VEC_W)

    return {
        "emb_pad": emb_pad,                              # (VOCAB_PAD, D)
        "pos": params["pos_emb"],                        # (S, D)
        "wqkv": jnp.stack(wqkv_all),                     # (L, D, 3D)
        "wo": jnp.concatenate(wo_all, axis=0),           # (L*H, HD, D)
        "w1": jnp.stack(w1_all),                         # (L, D, F)
        "w2": jnp.stack(w2_all),                         # (L, F, D)
        "vec": jnp.stack(vec_all),                       # (L, 4, VEC_W)
        "fc_w": params["fc_w"].T,                        # (D, 1)
        "fc_b": params["fc_b"],                          # (1, 1)
    }


# ------------------------------ full forward ---------------------------------
@jax.jit
def net_forward(tokens, packed):
    B, S = tokens.shape
    BS = B * S

    tok2 = tokens.reshape(BS, 1).astype(jnp.int32)
    # block-diagonal additive attention mask over the flattened batch
    bid = jnp.repeat(jnp.arange(B, dtype=jnp.int32), S)
    attn_bias = jnp.where(bid[:, None] == bid[None, :], 0.0, -1e30).astype(jnp.float32)

    kernel = functools.partial(
        _net_kernel, batch=B, seq=S, d_model=D_MODEL, nhead=NHEAD,
        dim_ff=DIM_FF, num_layers=NUM_LAYERS)

    vmem = pl.BlockSpec(memory_space=pltpu.MemorySpace.VMEM)
    return pl.pallas_call(
        kernel,
        out_shape=jax.ShapeDtypeStruct((B, 1), jnp.float32),
        in_specs=[vmem] * 11,
        out_specs=pl.BlockSpec(memory_space=pltpu.MemorySpace.VMEM),
    )(tok2, packed["emb_pad"], packed["pos"], attn_bias,
      packed["wqkv"], packed["wo"], packed["w1"], packed["w2"], packed["vec"],
      packed["fc_w"], packed["fc_b"])


if __name__ == "__main__":
    key = jax.random.PRNGKey(0)
    pkey, tkey = jax.random.split(key)
    params = init_params(pkey)
    packed = pack_params(params)
    tokens = jax.random.randint(tkey, (BATCH, MAX_LEN), 0, VOCAB_SIZE, dtype=jnp.int32)
    out = net_forward(tokens, packed)
    out = jax.block_until_ready(out)
    assert out.shape == (BATCH, 1) and out.dtype == jnp.float32
    print("KERNEL_OK")
</pallas_src>

<mosaic_0001>
module attributes {stable_mosaic.version = 11 : i64} {
  func.func @_net_kernel(%arg0: memref<16x1xi32, #tpu.memory_space<vmem>>, %arg1: memref<128x32xf32, #tpu.memory_space<vmem>>, %arg2: memref<8x32xf32, #tpu.memory_space<vmem>>, %arg3: memref<16x16xf32, #tpu.memory_space<vmem>>, %arg4: memref<2x32x96xf32, #tpu.memory_space<vmem>>, %arg5: memref<8x8x32xf32, #tpu.memory_space<vmem>>, %arg6: memref<2x32x64xf32, #tpu.memory_space<vmem>>, %arg7: memref<2x64x32xf32, #tpu.memory_space<vmem>>, %arg8: memref<2x4x96xf32, #tpu.memory_space<vmem>>, %arg9: memref<32x1xf32, #tpu.memory_space<vmem>>, %arg10: memref<1x1xf32, #tpu.memory_space<vmem>>, %arg11: memref<2x1xf32, #tpu.memory_space<vmem>>) attributes {dimension_semantics = [], scalar_prefetch = 0 : i64, scratch_operands = 0 : i64, tpu.core_type = #tpu.core_type<tc>} {
    %c0 = arith.constant 0 : index
    %c0_0 = arith.constant 0 : index
    %0 = vector.load %arg0[%c0, %c0_0] : memref<16x1xi32, #tpu.memory_space<vmem>>, vector<16x1xi32>
    %1 = tpu.iota {dimensions = array<i32: 1>} : vector<16x128xi32>
    %2 = vector.broadcast %0 : vector<16x1xi32> to vector<16x128xi32>
    %3 = arith.cmpi eq, %1, %2 : vector<16x128xi32>
    %4 = arith.extui %3 : vector<16x128xi1> to vector<16x128xi32>
    %5 = arith.sitofp %4 : vector<16x128xi32> to vector<16x128xf32>
    %c0_1 = arith.constant 0 : index
    %c0_2 = arith.constant 0 : index
    %6 = vector.load %arg1[%c0_1, %c0_2] : memref<128x32xf32, #tpu.memory_space<vmem>>, vector<128x32xf32>
    %cst = arith.constant dense<0.000000e+00> : vector<16x32xf32>
    %7 = tpu.matmul %5, %6, %cst {dimension_numbers = #tpu.dot_dimension_numbers<[1], [0], [0], [1], [0, 0, 1, 1], [], []>} : vector<16x128xf32>, vector<128x32xf32>, vector<16x32xf32> -> vector<16x32xf32>
    %c0_3 = arith.constant 0 : index
    %c0_4 = arith.constant 0 : index
    %8 = vector.load %arg2[%c0_3, %c0_4] : memref<8x32xf32, #tpu.memory_space<vmem>>, vector<8x32xf32>
    %9 = tpu.concatenate %8, %8 in 0 : vector<8x32xf32>, vector<8x32xf32> -> vector<16x32xf32>
    %10 = arith.addf %7, %9 : vector<16x32xf32>
    %c0_5 = arith.constant 0 : index
    %c0_6 = arith.constant 0 : index
    %11 = vector.load %arg3[%c0_5, %c0_6] : memref<16x16xf32, #tpu.memory_space<vmem>>, vector<16x16xf32>
    %12 = vector.shape_cast %11 : vector<16x16xf32> to vector<1x16x16xf32>
    %c0_7 = arith.constant 0 : index
    %c0_8 = arith.constant 0 : index
    %c0_9 = arith.constant 0 : index
    %13 = vector.load %arg4[%c0_7, %c0_8, %c0_9] : memref<2x32x96xf32, #tpu.memory_space<vmem>>, vector<1x32x96xf32>
    %14 = vector.shape_cast %13 : vector<1x32x96xf32> to vector<32x96xf32>
    %c0_10 = arith.constant 0 : index
    %c0_11 = arith.constant 0 : index
    %c0_12 = arith.constant 0 : index
    %15 = vector.load %arg5[%c0_10, %c0_11, %c0_12] : memref<8x8x32xf32, #tpu.memory_space<vmem>>, vector<4x8x32xf32>
    %c0_13 = arith.constant 0 : index
    %c0_14 = arith.constant 0 : index
    %c0_15 = arith.constant 0 : index
    %16 = vector.load %arg6[%c0_13, %c0_14, %c0_15] : memref<2x32x64xf32, #tpu.memory_space<vmem>>, vector<1x32x64xf32>
    %17 = vector.shape_cast %16 : vector<1x32x64xf32> to vector<32x64xf32>
    %c0_16 = arith.constant 0 : index
    %c0_17 = arith.constant 0 : index
    %c0_18 = arith.constant 0 : index
    %18 = vector.load %arg7[%c0_16, %c0_17, %c0_18] : memref<2x64x32xf32, #tpu.memory_space<vmem>>, vector<1x64x32xf32>
    %19 = vector.shape_cast %18 : vector<1x64x32xf32> to vector<64x32xf32>
    %c0_19 = arith.constant 0 : index
    %c0_20 = arith.constant 0 : index
    %c0_21 = arith.constant 0 : index
    %20 = vector.load %arg8[%c0_19, %c0_20, %c0_21] : memref<2x4x96xf32, #tpu.memory_space<vmem>>, vector<1x4x96xf32>
    %21 = vector.shape_cast %20 : vector<1x4x96xf32> to vector<4x96xf32>
    %22 = vector.extract_strided_slice %21 {offsets = [0, 0], sizes = [1, 96], strides = [1, 1]} : vector<4x96xf32> to vector<1x96xf32>
    %23 = vector.extract_strided_slice %21 {offsets = [1, 0], sizes = [1, 32], strides = [1, 1]} : vector<4x96xf32> to vector<1x32xf32>
    %24 = vector.extract_strided_slice %21 {offsets = [1, 32], sizes = [1, 32], strides = [1, 1]} : vector<4x96xf32> to vector<1x32xf32>
    %25 = vector.extract_strided_slice %21 {offsets = [1, 64], sizes = [1, 32], strides = [1, 1]} : vector<4x96xf32> to vector<1x32xf32>
    %26 = vector.extract_strided_slice %21 {offsets = [2, 0], sizes = [1, 64], strides = [1, 1]} : vector<4x96xf32> to vector<1x64xf32>
    %27 = vector.extract_strided_slice %21 {offsets = [3, 0], sizes = [1, 32], strides = [1, 1]} : vector<4x96xf32> to vector<1x32xf32>
    %28 = vector.extract_strided_slice %21 {offsets = [3, 32], sizes = [1, 32], strides = [1, 1]} : vector<4x96xf32> to vector<1x32xf32>
    %29 = vector.extract_strided_slice %21 {offsets = [3, 64], sizes = [1, 32], strides = [1, 1]} : vector<4x96xf32> to vector<1x32xf32>
    %cst_22 = arith.constant dense<0.000000e+00> : vector<16x96xf32>
    %30 = tpu.matmul %10, %14, %cst_22 {dimension_numbers = #tpu.dot_dimension_numbers<[1], [0], [0], [1], [0, 0, 1, 1], [], []>} : vector<16x32xf32>, vector<32x96xf32>, vector<16x96xf32> -> vector<16x96xf32>
    %31 = vector.broadcast %22 : vector<1x96xf32> to vector<16x96xf32>
    %32 = arith.addf %30, %31 : vector<16x96xf32>
    %33 = vector.extract_strided_slice %32 {offsets = [0, 0], sizes = [16, 8], strides = [1, 1]} : vector<16x96xf32> to vector<16x8xf32>
    %34 = vector.extract_strided_slice %32 {offsets = [0, 8], sizes = [16, 8], strides = [1, 1]} : vector<16x96xf32> to vector<16x8xf32>
    %35 = vector.extract_strided_slice %32 {offsets = [0, 16], sizes = [16, 8], strides = [1, 1]} : vector<16x96xf32> to vector<16x8xf32>
    %36 = vector.extract_strided_slice %32 {offsets = [0, 24], sizes = [16, 8], strides = [1, 1]} : vector<16x96xf32> to vector<16x8xf32>
    %37 = vector.shape_cast %33 : vector<16x8xf32> to vector<1x16x8xf32>
    %38 = vector.shape_cast %34 : vector<16x8xf32> to vector<1x16x8xf32>
    %39 = vector.shape_cast %35 : vector<16x8xf32> to vector<1x16x8xf32>
    %40 = vector.shape_cast %36 : vector<16x8xf32> to vector<1x16x8xf32>
    %41 = tpu.concatenate %37, %38, %39, %40 in 0 : vector<1x16x8xf32>, vector<1x16x8xf32>, vector<1x16x8xf32>, vector<1x16x8xf32> -> vector<4x16x8xf32>
    %42 = vector.extract_strided_slice %32 {offsets = [0, 32], sizes = [16, 8], strides = [1, 1]} : vector<16x96xf32> to vector<16x8xf32>
    %43 = vector.extract_strided_slice %32 {offsets = [0, 40], sizes = [16, 8], strides = [1, 1]} : vector<16x96xf32> to vector<16x8xf32>
    %44 = vector.extract_strided_slice %32 {offsets = [0, 48], sizes = [16, 8], strides = [1, 1]} : vector<16x96xf32> to vector<16x8xf32>
    %45 = vector.extract_strided_slice %32 {offsets = [0, 56], sizes = [16, 8], strides = [1, 1]} : vector<16x96xf32> to vector<16x8xf32>
    %46 = vector.shape_cast %42 : vector<16x8xf32> to vector<1x16x8xf32>
    %47 = vector.shape_cast %43 : vector<16x8xf32> to vector<1x16x8xf32>
    %48 = vector.shape_cast %44 : vector<16x8xf32> to vector<1x16x8xf32>
    %49 = vector.shape_cast %45 : vector<16x8xf32> to vector<1x16x8xf32>
    %50 = tpu.concatenate %46, %47, %48, %49 in 0 : vector<1x16x8xf32>, vector<1x16x8xf32>, vector<1x16x8xf32>, vector<1x16x8xf32> -> vector<4x16x8xf32>
    %51 = vector.extract_strided_slice %32 {offsets = [0, 64], sizes = [16, 8], strides = [1, 1]} : vector<16x96xf32> to vector<16x8xf32>
    %52 = vector.extract_strided_slice %32 {offsets = [0, 72], sizes = [16, 8], strides = [1, 1]} : vector<16x96xf32> to vector<16x8xf32>
    %53 = vector.extract_strided_slice %32 {offsets = [0, 80], sizes = [16, 8], strides = [1, 1]} : vector<16x96xf32> to vector<16x8xf32>
    %54 = vector.extract_strided_slice %32 {offsets = [0, 88], sizes = [16, 8], strides = [1, 1]} : vector<16x96xf32> to vector<16x8xf32>
    %55 = vector.shape_cast %51 : vector<16x8xf32> to vector<1x16x8xf32>
    %56 = vector.shape_cast %52 : vector<16x8xf32> to vector<1x16x8xf32>
    %57 = vector.shape_cast %53 : vector<16x8xf32> to vector<1x16x8xf32>
    %58 = vector.shape_cast %54 : vector<16x8xf32> to vector<1x16x8xf32>
    %59 = tpu.concatenate %55, %56, %57, %58 in 0 : vector<1x16x8xf32>, vector<1x16x8xf32>, vector<1x16x8xf32>, vector<1x16x8xf32> -> vector<4x16x8xf32>
    "tpu.trace_start"() <{level = 10 : i32, message = "hqd,hkd->hqk"}> : () -> ()
    %cst_23 = arith.constant dense<0.000000e+00> : vector<4x16x16xf32>
    %60 = tpu.matmul %41, %50, %cst_23 {dimension_numbers = #tpu.dot_dimension_numbers<[2], [2], [1], [1], [0, 0, 0, 1, 1, 1], [0], [0]>} : vector<4x16x8xf32>, vector<4x16x8xf32>, vector<4x16x16xf32> -> vector<4x16x16xf32>
    "tpu.trace_stop"() : () -> ()
    %cst_24 = arith.constant 0.353553385 : f32
    %61 = vector.broadcast %cst_24 : f32 to vector<4x16x16xf32>
    %62 = arith.mulf %60, %61 : vector<4x16x16xf32>
    %63 = vector.broadcast %12 : vector<1x16x16xf32> to vector<4x16x16xf32>
    %64 = arith.addf %62, %63 : vector<4x16x16xf32>
    %cst_25 = arith.constant dense<0xFF800000> : vector<4x16xf32>
    %65 = vector.multi_reduction <maximumf>, %64, %cst_25 [2] : vector<4x16x16xf32> to vector<4x16xf32>
    %66 = vector.shape_cast %65 : vector<4x16xf32> to vector<4x16x1xf32>
    %67 = vector.broadcast %66 : vector<4x16x1xf32> to vector<4x16x16xf32>
    %68 = arith.subf %64, %67 : vector<4x16x16xf32>
    %69 = math.exp %68 : vector<4x16x16xf32>
    %cst_26 = arith.constant dense<0.000000e+00> : vector<4x16xf32>
    %70 = vector.multi_reduction <add>, %69, %cst_26 [2] : vector<4x16x16xf32> to vector<4x16xf32>
    %71 = vector.shape_cast %70 : vector<4x16xf32> to vector<4x16x1xf32>
    %72 = tpu.reciprocal %71 {approx = true} : vector<4x16x1xf32> -> vector<4x16x1xf32>
    %73 = vector.broadcast %72 : vector<4x16x1xf32> to vector<4x16x16xf32>
    %74 = arith.mulf %69, %73 : vector<4x16x16xf32>
    "tpu.trace_start"() <{level = 10 : i32, message = "hqk,hkd->hqd"}> : () -> ()
    %cst_27 = arith.constant dense<0.000000e+00> : vector<4x16x8xf32>
    %75 = tpu.matmul %74, %59, %cst_27 {dimension_numbers = #tpu.dot_dimension_numbers<[2], [1], [1], [2], [0, 0, 0, 1, 1, 2], [0], [0]>} : vector<4x16x16xf32>, vector<4x16x8xf32>, vector<4x16x8xf32> -> vector<4x16x8xf32>
    "tpu.trace_stop"() : () -> ()
    "tpu.trace_start"() <{level = 10 : i32, message = "hsd,hdo->hso"}> : () -> ()
    %cst_28 = arith.constant dense<0.000000e+00> : vector<4x16x32xf32>
    %76 = tpu.matmul %75, %15, %cst_28 {dimension_numbers = #tpu.dot_dimension_numbers<[2], [1], [1], [2], [0, 0, 0, 1, 1, 2], [0], [0]>} : vector<4x16x8xf32>, vector<4x8x32xf32>, vector<4x16x32xf32> -> vector<4x16x32xf32>
    "tpu.trace_stop"() : () -> ()
    %cst_29 = arith.constant dense<0.000000e+00> : vector<16x32xf32>
    %77 = vector.multi_reduction <add>, %76, %cst_29 [0] : vector<4x16x32xf32> to vector<16x32xf32>
    %78 = vector.broadcast %23 : vector<1x32xf32> to vector<16x32xf32>
    %79 = arith.addf %77, %78 : vector<16x32xf32>
    %80 = arith.addf %10, %79 : vector<16x32xf32>
    %cst_30 = arith.constant dense<0.000000e+00> : vector<16xf32>
    %81 = vector.multi_reduction <add>, %80, %cst_30 [1] : vector<16x32xf32> to vector<16xf32>
    %82 = vector.shape_cast %81 : vector<16xf32> to vector<16x1xf32>
    %cst_31 = arith.constant 3.200000e+01 : f32
    %83 = vector.broadcast %cst_31 : f32 to vector<16x1xf32>
    %84 = arith.divf %82, %83 : vector<16x1xf32>
    %85 = vector.broadcast %84 : vector<16x1xf32> to vector<16x32xf32>
    %86 = arith.subf %80, %85 : vector<16x32xf32>
    %87 = arith.mulf %86, %86 : vector<16x32xf32>
    %cst_32 = arith.constant dense<0.000000e+00> : vector<16xf32>
    %88 = vector.multi_reduction <add>, %87, %cst_32 [1] : vector<16x32xf32> to vector<16xf32>
    %89 = vector.shape_cast %88 : vector<16xf32> to vector<16x1xf32>
    %cst_33 = arith.constant 3.200000e+01 : f32
    %90 = vector.broadcast %cst_33 : f32 to vector<16x1xf32>
    %91 = arith.divf %89, %90 : vector<16x1xf32>
    %92 = vector.broadcast %84 : vector<16x1xf32> to vector<16x32xf32>
    %93 = arith.subf %80, %92 : vector<16x32xf32>
    %cst_34 = arith.constant 9.99999974E-6 : f32
    %94 = vector.broadcast %cst_34 : f32 to vector<16x1xf32>
    %95 = arith.addf %91, %94 : vector<16x1xf32>
    %96 = math.rsqrt %95 : vector<16x1xf32>
    %97 = vector.broadcast %96 : vector<16x1xf32> to vector<16x32xf32>
    %98 = arith.mulf %93, %97 : vector<16x32xf32>
    %99 = vector.broadcast %24 : vector<1x32xf32> to vector<16x32xf32>
    %100 = arith.mulf %98, %99 : vector<16x32xf32>
    %101 = vector.broadcast %25 : vector<1x32xf32> to vector<16x32xf32>
    %102 = arith.addf %100, %101 : vector<16x32xf32>
    %cst_35 = arith.constant dense<0.000000e+00> : vector<16x64xf32>
    %103 = tpu.matmul %102, %17, %cst_35 {dimension_numbers = #tpu.dot_dimension_numbers<[1], [0], [0], [1], [0, 0, 1, 1], [], []>} : vector<16x32xf32>, vector<32x64xf32>, vector<16x64xf32> -> vector<16x64xf32>
    %104 = vector.broadcast %26 : vector<1x64xf32> to vector<16x64xf32>
    %105 = arith.addf %103, %104 : vector<16x64xf32>
    %cst_36 = arith.constant 0.000000e+00 : f32
    %106 = vector.broadcast %cst_36 : f32 to vector<16x64xf32>
    %107 = arith.maximumf %105, %106 : vector<16x64xf32>
    %cst_37 = arith.constant dense<0.000000e+00> : vector<16x32xf32>
    %108 = tpu.matmul %107, %19, %cst_37 {dimension_numbers = #tpu.dot_dimension_numbers<[1], [0], [0], [1], [0, 0, 1, 1], [], []>} : vector<16x64xf32>, vector<64x32xf32>, vector<16x32xf32> -> vector<16x32xf32>
    %109 = vector.broadcast %27 : vector<1x32xf32> to vector<16x32xf32>
    %110 = arith.addf %108, %109 : vector<16x32xf32>
    %111 = arith.addf %102, %110 : vector<16x32xf32>
    %cst_38 = arith.constant dense<0.000000e+00> : vector<16xf32>
    %112 = vector.multi_reduction <add>, %111, %cst_38 [1] : vector<16x32xf32> to vector<16xf32>
    %113 = vector.shape_cast %112 : vector<16xf32> to vector<16x1xf32>
    %cst_39 = arith.constant 3.200000e+01 : f32
    %114 = vector.broadcast %cst_39 : f32 to vector<16x1xf32>
    %115 = arith.divf %113, %114 : vector<16x1xf32>
    %116 = vector.broadcast %115 : vector<16x1xf32> to vector<16x32xf32>
    %117 = arith.subf %111, %116 : vector<16x32xf32>
    %118 = arith.mulf %117, %117 : vector<16x32xf32>
    %cst_40 = arith.constant dense<0.000000e+00> : vector<16xf32>
    %119 = vector.multi_reduction <add>, %118, %cst_40 [1] : vector<16x32xf32> to vector<16xf32>
    %120 = vector.shape_cast %119 : vector<16xf32> to vector<16x1xf32>
    %cst_41 = arith.constant 3.200000e+01 : f32
    %121 = vector.broadcast %cst_41 : f32 to vector<16x1xf32>
    %122 = arith.divf %120, %121 : vector<16x1xf32>
    %123 = vector.broadcast %115 : vector<16x1xf32> to vector<16x32xf32>
    %124 = arith.subf %111, %123 : vector<16x32xf32>
    %cst_42 = arith.constant 9.99999974E-6 : f32
    %125 = vector.broadcast %cst_42 : f32 to vector<16x1xf32>
    %126 = arith.addf %122, %125 : vector<16x1xf32>
    %127 = math.rsqrt %126 : vector<16x1xf32>
    %128 = vector.broadcast %127 : vector<16x1xf32> to vector<16x32xf32>
    %129 = arith.mulf %124, %128 : vector<16x32xf32>
    %130 = vector.broadcast %28 : vector<1x32xf32> to vector<16x32xf32>
    %131 = arith.mulf %129, %130 : vector<16x32xf32>
    %132 = vector.broadcast %29 : vector<1x32xf32> to vector<16x32xf32>
    %133 = arith.addf %131, %132 : vector<16x32xf32>
    %c1 = arith.constant 1 : index
    %c0_43 = arith.constant 0 : index
    %c0_44 = arith.constant 0 : index
    %134 = vector.load %arg4[%c1, %c0_43, %c0_44] : memref<2x32x96xf32, #tpu.memory_space<vmem>>, vector<1x32x96xf32>
    %135 = vector.shape_cast %134 : vector<1x32x96xf32> to vector<32x96xf32>
    %c4 = arith.constant 4 : index
    %c0_45 = arith.constant 0 : index
    %c0_46 = arith.constant 0 : index
    %136 = vector.load %arg5[%c4, %c0_45, %c0_46] : memref<8x8x32xf32, #tpu.memory_space<vmem>>, vector<4x8x32xf32>
    %c1_47 = arith.constant 1 : index
    %c0_48 = arith.constant 0 : index
    %c0_49 = arith.constant 0 : index
    %137 = vector.load %arg6[%c1_47, %c0_48, %c0_49] : memref<2x32x64xf32, #tpu.memory_space<vmem>>, vector<1x32x64xf32>
    %138 = vector.shape_cast %137 : vector<1x32x64xf32> to vector<32x64xf32>
    %c1_50 = arith.constant 1 : index
    %c0_51 = arith.constant 0 : index
    %c0_52 = arith.constant 0 : index
    %139 = vector.load %arg7[%c1_50, %c0_51, %c0_52] : memref<2x64x32xf32, #tpu.memory_space<vmem>>, vector<1x64x32xf32>
    %140 = vector.shape_cast %139 : vector<1x64x32xf32> to vector<64x32xf32>
    %c1_53 = arith.constant 1 : index
    %c0_54 = arith.constant 0 : index
    %c0_55 = arith.constant 0 : index
    %141 = vector.load %arg8[%c1_53, %c0_54, %c0_55] : memref<2x4x96xf32, #tpu.memory_space<vmem>>, vector<1x4x96xf32>
    %142 = vector.shape_cast %141 : vector<1x4x96xf32> to vector<4x96xf32>
    %143 = vector.extract_strided_slice %142 {offsets = [0, 0], sizes = [1, 96], strides = [1, 1]} : vector<4x96xf32> to vector<1x96xf32>
    %144 = vector.extract_strided_slice %142 {offsets = [1, 0], sizes = [1, 32], strides = [1, 1]} : vector<4x96xf32> to vector<1x32xf32>
    %145 = vector.extract_strided_slice %142 {offsets = [1, 32], sizes = [1, 32], strides = [1, 1]} : vector<4x96xf32> to vector<1x32xf32>
    %146 = vector.extract_strided_slice %142 {offsets = [1, 64], sizes = [1, 32], strides = [1, 1]} : vector<4x96xf32> to vector<1x32xf32>
    %147 = vector.extract_strided_slice %142 {offsets = [2, 0], sizes = [1, 64], strides = [1, 1]} : vector<4x96xf32> to vector<1x64xf32>
    %148 = vector.extract_strided_slice %142 {offsets = [3, 0], sizes = [1, 32], strides = [1, 1]} : vector<4x96xf32> to vector<1x32xf32>
    %149 = vector.extract_strided_slice %142 {offsets = [3, 32], sizes = [1, 32], strides = [1, 1]} : vector<4x96xf32> to vector<1x32xf32>
    %150 = vector.extract_strided_slice %142 {offsets = [3, 64], sizes = [1, 32], strides = [1, 1]} : vector<4x96xf32> to vector<1x32xf32>
    %cst_56 = arith.constant dense<0.000000e+00> : vector<16x96xf32>
    %151 = tpu.matmul %133, %135, %cst_56 {dimension_numbers = #tpu.dot_dimension_numbers<[1], [0], [0], [1], [0, 0, 1, 1], [], []>} : vector<16x32xf32>, vector<32x96xf32>, vector<16x96xf32> -> vector<16x96xf32>
    %152 = vector.broadcast %143 : vector<1x96xf32> to vector<16x96xf32>
    %153 = arith.addf %151, %152 : vector<16x96xf32>
    %154 = vector.extract_strided_slice %153 {offsets = [0, 0], sizes = [16, 8], strides = [1, 1]} : vector<16x96xf32> to vector<16x8xf32>
    %155 = vector.extract_strided_slice %153 {offsets = [0, 8], sizes = [16, 8], strides = [1, 1]} : vector<16x96xf32> to vector<16x8xf32>
    %156 = vector.extract_strided_slice %153 {offsets = [0, 16], sizes = [16, 8], strides = [1, 1]} : vector<16x96xf32> to vector<16x8xf32>
    %157 = vector.extract_strided_slice %153 {offsets = [0, 24], sizes = [16, 8], strides = [1, 1]} : vector<16x96xf32> to vector<16x8xf32>
    %158 = vector.shape_cast %154 : vector<16x8xf32> to vector<1x16x8xf32>
    %159 = vector.shape_cast %155 : vector<16x8xf32> to vector<1x16x8xf32>
    %160 = vector.shape_cast %156 : vector<16x8xf32> to vector<1x16x8xf32>
    %161 = vector.shape_cast %157 : vector<16x8xf32> to vector<1x16x8xf32>
    %162 = tpu.concatenate %158, %159, %160, %161 in 0 : vector<1x16x8xf32>, vector<1x16x8xf32>, vector<1x16x8xf32>, vector<1x16x8xf32> -> vector<4x16x8xf32>
    %163 = vector.extract_strided_slice %153 {offsets = [0, 32], sizes = [16, 8], strides = [1, 1]} : vector<16x96xf32> to vector<16x8xf32>
    %164 = vector.extract_strided_slice %153 {offsets = [0, 40], sizes = [16, 8], strides = [1, 1]} : vector<16x96xf32> to vector<16x8xf32>
    %165 = vector.extract_strided_slice %153 {offsets = [0, 48], sizes = [16, 8], strides = [1, 1]} : vector<16x96xf32> to vector<16x8xf32>
    %166 = vector.extract_strided_slice %153 {offsets = [0, 56], sizes = [16, 8], strides = [1, 1]} : vector<16x96xf32> to vector<16x8xf32>
    %167 = vector.shape_cast %163 : vector<16x8xf32> to vector<1x16x8xf32>
    %168 = vector.shape_cast %164 : vector<16x8xf32> to vector<1x16x8xf32>
    %169 = vector.shape_cast %165 : vector<16x8xf32> to vector<1x16x8xf32>
    %170 = vector.shape_cast %166 : vector<16x8xf32> to vector<1x16x8xf32>
    %171 = tpu.concatenate %167, %168, %169, %170 in 0 : vector<1x16x8xf32>, vector<1x16x8xf32>, vector<1x16x8xf32>, vector<1x16x8xf32> -> vector<4x16x8xf32>
    %172 = vector.extract_strided_slice %153 {offsets = [0, 64], sizes = [16, 8], strides = [1, 1]} : vector<16x96xf32> to vector<16x8xf32>
    %173 = vector.extract_strided_slice %153 {offsets = [0, 72], sizes = [16, 8], strides = [1, 1]} : vector<16x96xf32> to vector<16x8xf32>
    %174 = vector.extract_strided_slice %153 {offsets = [0, 80], sizes = [16, 8], strides = [1, 1]} : vector<16x96xf32> to vector<16x8xf32>
    %175 = vector.extract_strided_slice %153 {offsets = [0, 88], sizes = [16, 8], strides = [1, 1]} : vector<16x96xf32> to vector<16x8xf32>
    %176 = vector.shape_cast %172 : vector<16x8xf32> to vector<1x16x8xf32>
    %177 = vector.shape_cast %173 : vector<16x8xf32> to vector<1x16x8xf32>
    %178 = vector.shape_cast %174 : vector<16x8xf32> to vector<1x16x8xf32>
    %179 = vector.shape_cast %175 : vector<16x8xf32> to vector<1x16x8xf32>
    %180 = tpu.concatenate %176, %177, %178, %179 in 0 : vector<1x16x8xf32>, vector<1x16x8xf32>, vector<1x16x8xf32>, vector<1x16x8xf32> -> vector<4x16x8xf32>
    "tpu.trace_start"() <{level = 10 : i32, message = "hqd,hkd->hqk"}> : () -> ()
    %cst_57 = arith.constant dense<0.000000e+00> : vector<4x16x16xf32>
    %181 = tpu.matmul %162, %171, %cst_57 {dimension_numbers = #tpu.dot_dimension_numbers<[2], [2], [1], [1], [0, 0, 0, 1, 1, 1], [0], [0]>} : vector<4x16x8xf32>, vector<4x16x8xf32>, vector<4x16x16xf32> -> vector<4x16x16xf32>
    "tpu.trace_stop"() : () -> ()
    %cst_58 = arith.constant 0.353553385 : f32
    %182 = vector.broadcast %cst_58 : f32 to vector<4x16x16xf32>
    %183 = arith.mulf %181, %182 : vector<4x16x16xf32>
    %184 = vector.broadcast %12 : vector<1x16x16xf32> to vector<4x16x16xf32>
    %185 = arith.addf %183, %184 : vector<4x16x16xf32>
    %cst_59 = arith.constant dense<0xFF800000> : vector<4x16xf32>
    %186 = vector.multi_reduction <maximumf>, %185, %cst_59 [2] : vector<4x16x16xf32> to vector<4x16xf32>
    %187 = vector.shape_cast %186 : vector<4x16xf32> to vector<4x16x1xf32>
    %188 = vector.broadcast %187 : vector<4x16x1xf32> to vector<4x16x16xf32>
    %189 = arith.subf %185, %188 : vector<4x16x16xf32>
    %190 = math.exp %189 : vector<4x16x16xf32>
    %cst_60 = arith.constant dense<0.000000e+00> : vector<4x16xf32>
    %191 = vector.multi_reduction <add>, %190, %cst_60 [2] : vector<4x16x16xf32> to vector<4x16xf32>
    %192 = vector.shape_cast %191 : vector<4x16xf32> to vector<4x16x1xf32>
    %193 = tpu.reciprocal %192 {approx = true} : vector<4x16x1xf32> -> vector<4x16x1xf32>
    %194 = vector.broadcast %193 : vector<4x16x1xf32> to vector<4x16x16xf32>
    %195 = arith.mulf %190, %194 : vector<4x16x16xf32>
    "tpu.trace_start"() <{level = 10 : i32, message = "hqk,hkd->hqd"}> : () -> ()
    %cst_61 = arith.constant dense<0.000000e+00> : vector<4x16x8xf32>
    %196 = tpu.matmul %195, %180, %cst_61 {dimension_numbers = #tpu.dot_dimension_numbers<[2], [1], [1], [2], [0, 0, 0, 1, 1, 2], [0], [0]>} : vector<4x16x16xf32>, vector<4x16x8xf32>, vector<4x16x8xf32> -> vector<4x16x8xf32>
    "tpu.trace_stop"() : () -> ()
    "tpu.trace_start"() <{level = 10 : i32, message = "hsd,hdo->hso"}> : () -> ()
    %cst_62 = arith.constant dense<0.000000e+00> : vector<4x16x32xf32>
    %197 = tpu.matmul %196, %136, %cst_62 {dimension_numbers = #tpu.dot_dimension_numbers<[2], [1], [1], [2], [0, 0, 0, 1, 1, 2], [0], [0]>} : vector<4x16x8xf32>, vector<4x8x32xf32>, vector<4x16x32xf32> -> vector<4x16x32xf32>
    "tpu.trace_stop"() : () -> ()
    %cst_63 = arith.constant dense<0.000000e+00> : vector<16x32xf32>
    %198 = vector.multi_reduction <add>, %197, %cst_63 [0] : vector<4x16x32xf32> to vector<16x32xf32>
    %199 = vector.broadcast %144 : vector<1x32xf32> to vector<16x32xf32>
    %200 = arith.addf %198, %199 : vector<16x32xf32>
    %201 = arith.addf %133, %200 : vector<16x32xf32>
    %cst_64 = arith.constant dense<0.000000e+00> : vector<16xf32>
    %202 = vector.multi_reduction <add>, %201, %cst_64 [1] : vector<16x32xf32> to vector<16xf32>
    %203 = vector.shape_cast %202 : vector<16xf32> to vector<16x1xf32>
    %cst_65 = arith.constant 3.200000e+01 : f32
    %204 = vector.broadcast %cst_65 : f32 to vector<16x1xf32>
    %205 = arith.divf %203, %204 : vector<16x1xf32>
    %206 = vector.broadcast %205 : vector<16x1xf32> to vector<16x32xf32>
    %207 = arith.subf %201, %206 : vector<16x32xf32>
    %208 = arith.mulf %207, %207 : vector<16x32xf32>
    %cst_66 = arith.constant dense<0.000000e+00> : vector<16xf32>
    %209 = vector.multi_reduction <add>, %208, %cst_66 [1] : vector<16x32xf32> to vector<16xf32>
    %210 = vector.shape_cast %209 : vector<16xf32> to vector<16x1xf32>
    %cst_67 = arith.constant 3.200000e+01 : f32
    %211 = vector.broadcast %cst_67 : f32 to vector<16x1xf32>
    %212 = arith.divf %210, %211 : vector<16x1xf32>
    %213 = vector.broadcast %205 : vector<16x1xf32> to vector<16x32xf32>
    %214 = arith.subf %201, %213 : vector<16x32xf32>
    %cst_68 = arith.constant 9.99999974E-6 : f32
    %215 = vector.broadcast %cst_68 : f32 to vector<16x1xf32>
    %216 = arith.addf %212, %215 : vector<16x1xf32>
    %217 = math.rsqrt %216 : vector<16x1xf32>
    %218 = vector.broadcast %217 : vector<16x1xf32> to vector<16x32xf32>
    %219 = arith.mulf %214, %218 : vector<16x32xf32>
    %220 = vector.broadcast %145 : vector<1x32xf32> to vector<16x32xf32>
    %221 = arith.mulf %219, %220 : vector<16x32xf32>
    %222 = vector.broadcast %146 : vector<1x32xf32> to vector<16x32xf32>
    %223 = arith.addf %221, %222 : vector<16x32xf32>
    %cst_69 = arith.constant dense<0.000000e+00> : vector<16x64xf32>
    %224 = tpu.matmul %223, %138, %cst_69 {dimension_numbers = #tpu.dot_dimension_numbers<[1], [0], [0], [1], [0, 0, 1, 1], [], []>} : vector<16x32xf32>, vector<32x64xf32>, vector<16x64xf32> -> vector<16x64xf32>
    %225 = vector.broadcast %147 : vector<1x64xf32> to vector<16x64xf32>
    %226 = arith.addf %224, %225 : vector<16x64xf32>
    %cst_70 = arith.constant 0.000000e+00 : f32
    %227 = vector.broadcast %cst_70 : f32 to vector<16x64xf32>
    %228 = arith.maximumf %226, %227 : vector<16x64xf32>
    %cst_71 = arith.constant dense<0.000000e+00> : vector<16x32xf32>
    %229 = tpu.matmul %228, %140, %cst_71 {dimension_numbers = #tpu.dot_dimension_numbers<[1], [0], [0], [1], [0, 0, 1, 1], [], []>} : vector<16x64xf32>, vector<64x32xf32>, vector<16x32xf32> -> vector<16x32xf32>
    %230 = vector.broadcast %148 : vector<1x32xf32> to vector<16x32xf32>
    %231 = arith.addf %229, %230 : vector<16x32xf32>
    %232 = arith.addf %223, %231 : vector<16x32xf32>
    %cst_72 = arith.constant dense<0.000000e+00> : vector<16xf32>
    %233 = vector.multi_reduction <add>, %232, %cst_72 [1] : vector<16x32xf32> to vector<16xf32>
    %234 = vector.shape_cast %233 : vector<16xf32> to vector<16x1xf32>
    %cst_73 = arith.constant 3.200000e+01 : f32
    %235 = vector.broadcast %cst_73 : f32 to vector<16x1xf32>
    %236 = arith.divf %234, %235 : vector<16x1xf32>
    %237 = vector.broadcast %236 : vector<16x1xf32> to vector<16x32xf32>
    %238 = arith.subf %232, %237 : vector<16x32xf32>
    %239 = arith.mulf %238, %238 : vector<16x32xf32>
    %cst_74 = arith.constant dense<0.000000e+00> : vector<16xf32>
    %240 = vector.multi_reduction <add>, %239, %cst_74 [1] : vector<16x32xf32> to vector<16xf32>
    %241 = vector.shape_cast %240 : vector<16xf32> to vector<16x1xf32>
    %cst_75 = arith.constant 3.200000e+01 : f32
    %242 = vector.broadcast %cst_75 : f32 to vector<16x1xf32>
    %243 = arith.divf %241, %242 : vector<16x1xf32>
    %244 = vector.broadcast %236 : vector<16x1xf32> to vector<16x32xf32>
    %245 = arith.subf %232, %244 : vector<16x32xf32>
    %cst_76 = arith.constant 9.99999974E-6 : f32
    %246 = vector.broadcast %cst_76 : f32 to vector<16x1xf32>
    %247 = arith.addf %243, %246 : vector<16x1xf32>
    %248 = math.rsqrt %247 : vector<16x1xf32>
    %249 = vector.broadcast %248 : vector<16x1xf32> to vector<16x32xf32>
    %250 = arith.mulf %245, %249 : vector<16x32xf32>
    %251 = vector.broadcast %149 : vector<1x32xf32> to vector<16x32xf32>
    %252 = arith.mulf %250, %251 : vector<16x32xf32>
    %253 = vector.broadcast %150 : vector<1x32xf32> to vector<16x32xf32>
    %254 = arith.addf %252, %253 : vector<16x32xf32>
    %255 = vector.extract_strided_slice %254 {offsets = [0, 0], sizes = [8, 32], strides = [1, 1]} : vector<16x32xf32> to vector<8x32xf32>
    %cst_77 = arith.constant dense<0xFF800000> : vector<32xf32>
    %256 = vector.multi_reduction <maximumf>, %255, %cst_77 [0] : vector<8x32xf32> to vector<32xf32>
    %257 = vector.shape_cast %256 : vector<32xf32> to vector<1x32xf32>
    %258 = vector.extract_strided_slice %254 {offsets = [8, 0], sizes = [8, 32], strides = [1, 1]} : vector<16x32xf32> to vector<8x32xf32>
    %cst_78 = arith.constant dense<0xFF800000> : vector<32xf32>
    %259 = vector.multi_reduction <maximumf>, %258, %cst_78 [0] : vector<8x32xf32> to vector<32xf32>
    %260 = vector.shape_cast %259 : vector<32xf32> to vector<1x32xf32>
    %261 = tpu.concatenate %257, %260 in 0 : vector<1x32xf32>, vector<1x32xf32> -> vector<2x32xf32>
    %c0_79 = arith.constant 0 : index
    %c0_80 = arith.constant 0 : index
    %262 = vector.load %arg9[%c0_79, %c0_80] : memref<32x1xf32, #tpu.memory_space<vmem>>, vector<32x1xf32>
    %cst_81 = arith.constant dense<0.000000e+00> : vector<2x1xf32>
    %263 = tpu.matmul %261, %262, %cst_81 {dimension_numbers = #tpu.dot_dimension_numbers<[1], [0], [0], [1], [0, 0, 1, 1], [], []>} : vector<2x32xf32>, vector<32x1xf32>, vector<2x1xf32> -> vector<2x1xf32>
    %c0_82 = arith.constant 0 : index
    %c0_83 = arith.constant 0 : index
    %264 = vector.load %arg10[%c0_82, %c0_83] : memref<1x1xf32, #tpu.memory_space<vmem>>, vector<1x1xf32>
    %265 = vector.broadcast %264 : vector<1x1xf32> to vector<2x1xf32>
    %266 = arith.addf %263, %265 : vector<2x1xf32>
    %c0_84 = arith.constant 0 : index
    %c0_85 = arith.constant 0 : index
    %267 = vector.load %arg11[%c0_84, %c0_85] : memref<2x1xf32, #tpu.memory_space<vmem>>, vector<2x1xf32>
    tpu.vector_store %arg11[%c0_84, %c0_85], %266 {strides = array<i32>} : memref<2x1xf32, #tpu.memory_space<vmem>>, vector<2x1xf32>,
    return
  }
}

</mosaic_0001>

<bundles_post_ra>
// kernel: eq.8
= control target key start
LH: loop header
LB: loop body
LE: loop exit
PB: predicated region body
PF: predicated region fallthrough
CT: control target
= control target key end

     0   :  { %vm7_vm0 = vcmask 64512   ;;  %vm13_vm1 = vcmask 130112   ;;  %s39_s0 = inlined_call_operand.vmem [shape: s32[2,8], index: 0, kind: input, shape index: {}]   ;;  %s40_s1 = inlined_call_operand.vmem [shape: s32[16], index: 1, kind: output, shape index: {}]  }
   0x1   :  { %v4_v0 = vld [vmem:[%s39_s0] sm:$0x3]  ;;  %s22_s0 = smov 8  }
   0x2   :  { %5 = vst [vmem:[#allocation1] sm:$0x3] %v4_v0 }
   0x9   :  { %v10_v1 = vld [vmem:[#allocation1 + $0x1] sm:$0x1]   ;;  %v6_v2 = vld [vmem:[#allocation1] sm:$0x1]  }
   0xa   :  { %11 = vrot.lane.b32.xlu0 %v10_v1, %s22_s0  ;;  %8 = vst.msk [vmem:[#allocation0] sm:$0x1] %vm7_vm0, %v6_v2  }
  0x7c   :  { %v12_v3 = vpop.permute.xlu0 %11  }
  0x7d   :  { %14 = vst.msk [vmem:[#allocation0] sm:$0x1] %vm13_vm1, %v12_v3  }
  0x84   :  { %v17_v4 = vld [vmem:[#allocation0] sm:$0x1] }
  0x85   :  { %20 = vst [vmem:[%s40_s1] sm:$0x1] %v17_v4 }

// kernel: net_forward.1
= control target key start
LH: loop header
LB: loop body
LE: loop exit
PB: predicated region body
PF: predicated region fallthrough
CT: control target
= control target key end

     0   :  { %v1917_v0 = vmov 0   ;;  %v42_v21 = vlaneseq  ;;  %v1918_v24 = vmov 1.0   ;;  %vm120_vm2 = vcmask 261120   ;;  %s1920_s24 = smov 104   ;;  %s1921_s25 = smov 96   ;;  %s2561_s0 = inlined_call_operand.vmem [shape: s32[16,1], index: 0, kind: input, shape index: {}]   ;;  %s2562_s1 = inlined_call_operand.vmem [shape: f32[128,32], index: 1, kind: input, shape index: {}]   ;;  %s2563_s4 = inlined_call_operand.vmem [shape: f32[2,32,96], index: 4, kind: input, shape index: {}]   ;;  %s2564_s2 = inlined_call_operand.vmem [shape: f32[8,32], index: 2, kind: input, shape index: {}]   ;;  %s2565_s8 = inlined_call_operand.vmem [shape: f32[2,4,96], index: 8, kind: input, shape index: {}]   ;;  %s2566_s3 = inlined_call_operand.vmem [shape: f32[16,16], index: 3, kind: input, shape index: {}]   ;;  %s2567_s5 = inlined_call_operand.vmem [shape: f32[8,8,32], index: 5, kind: input, shape index: {}]   ;;  %s2568_s6 = inlined_call_operand.vmem [shape: f32[2,32,64], index: 6, kind: input, shape index: {}]   ;;  %s2569_s7 = inlined_call_operand.vmem [shape: f32[2,64,32], index: 7, kind: input, shape index: {}]   ;;  %s2570_s9 = inlined_call_operand.vmem [shape: f32[32,1], index: 9, kind: input, shape index: {}]   ;;  %s2571_s10 = inlined_call_operand.<no memory space> [shape: f32[1,1], index: 10, kind: input, shape index: {}]   ;;  %s2572_s11 = inlined_call_operand.vmem [shape: f32[2,1], index: 11, kind: output, shape index: {}]  }
   0x1   :  { %1793 = vset.pattern.permute.xlu0 %v1917_v0  ;;  %v40_v1 = vld [vmem:[%s2561_s0] sm:$0xff]  ;;  %v71_v2 = vld [vmem:[%s2562_s1 + $0x78] sm:$0xff]  ;;  %v70_v3 = vld [vmem:[%s2562_s1 + $0x70] sm:$0xff]  ;;  %s1922_s26 = smov 120   ;;  %vm168_vm3 = vcmask 64512   ;;  %s1923_s27 = smov 64  }
   0x2   :  { %45 = vperm.xlu0 %1793, %v40_v1   ;;  %73 = vmatpush.msra.mxu0 %v71_v2  ;;  %v69_v4 = vld [vmem:[%s2562_s1 + $0x68] sm:$0xff]  ;;  %v68_v5 = vld [vmem:[%s2562_s1 + $0x60] sm:$0xff]  ;;  %v67_v7 = vld [vmem:[%s2562_s1 + $0x58] sm:$0xff]  ;;  %v43_v22 = vand.u32 127, %v42_v21  ;;  %vm321_vm4 = vcmask 130048   ;;  %vm780_vm12 = vcmask 523264  }
   0x3   :  { %v41_v6 = vld [vmem:[%s2561_s0 + $0x8] sm:$0xff]  ;;  %v66_v8 = vld [vmem:[%s2562_s1 + $0x50] sm:$0xff]  ;;  %v64_v10 = vld [vmem:[%s2562_s1 + $0x40] sm:$0xff] }
   0x4   :  { %74 = vmatpush.msra.mxu0 %v70_v3  ;;  %v65_v9 = vld [vmem:[%s2562_s1 + $0x48] sm:$0xff]  ;;  %v63_v11 = vld [vmem:[%s2562_s1 + $0x38] sm:$0xff]  ;;  %v62_v12 = vld [vmem:[%s2562_s1 + $0x30] sm:$0xff] }
   0x5   :  { %v61_v13 = vld [vmem:[%s2562_s1 + $0x28] sm:$0xff]  ;;  %v60_v14 = vld [vmem:[%s2562_s1 + $0x20] sm:$0xff]  ;;  %v59_v15 = vld [vmem:[%s2562_s1 + $0x18] sm:$0xff] }
   0x6   :  { %75 = vmatpush.msra.mxu0 %v69_v4  ;;  %v58_v16 = vld [vmem:[%s2562_s1 + $0x10] sm:$0xff]  ;;  %v57_v17 = vld [vmem:[%s2562_s1 + $0x8] sm:$0xff]  ;;  %v56_v18 = vld [vmem:[%s2562_s1] sm:$0xff] }
   0x7   :  { %v101_v19 = vld [vmem:[%s2563_s4 + $0x18] sm:$0xff]  ;;  %v100_v20 = vld [vmem:[%s2563_s4 + $0x10] sm:$0xff]  ;;  %v99_v26 = vld [vmem:[%s2563_s4 + $0x8] sm:$0xff] }
   0x8   :  { %76 = vmatpush.msra.mxu0 %v68_v5  ;;  %139 = vmatpush.msra.mxu1 %v101_v19  ;;  %v98_v27 = vld [vmem:[%s2563_s4] sm:$0xff]  ;;  %v2131_v63 = vld [vmem:[%s2566_s3 + $0x8] sm:$0xff] }
   0x9   :  { %v72_v28 = vld [vmem:[%s2564_s2] sm:$0xff]  ;;  %s1919_s2 = smov 112  }
   0xa   :  { %48 = vperm.xlu0 %1793, %v41_v6   ;;  %77 = vmatpush.msra.mxu0 %v67_v7  ;;  %v2065_v33 = vld [vmem:[%s2565_s8] sm:$0xf] }
   0xb   :  { %140 = vmatpush.msra.mxu1 %v100_v20  ;;  %v119_v34 = vperm.slane %v2065_v33, 0  ;;  %v2122_v55 = vld [vmem:[%s2566_s3] sm:$0xff] }
   0xc   :  { %78 = vmatpush.msra.mxu0 %v66_v8 }
   0xd   :  { %141 = vmatpush.msra.mxu1 %v99_v26 }
   0xe   :  { %79 = vmatpush.msra.mxu0 %v65_v9 }
   0xf   :  { %142 = vmatpush.msra.mxu1 %v98_v27 }
  0x10   :  { %80 = vmatpush.msra.mxu0 %v64_v10 }
  0x12   :  { %81 = vmatpush.msra.mxu0 %v63_v11 }
  0x14   :  { %82 = vmatpush.msra.mxu0 %v62_v12 }
  0x16   :  { %83 = vmatpush.msra.mxu0 %v61_v13 }
  0x18   :  { %84 = vmatpush.msra.mxu0 %v60_v14 }
  0x1a   :  { %85 = vmatpush.msra.mxu0 %v59_v15 }
  0x1c   :  { %86 = vmatpush.msra.mxu0 %v58_v16 }
  0x1e   :  { %87 = vmatpush.msra.mxu0 %v57_v17 }
  0x20   :  { %88 = vmatpush.msra.mxu0 %v56_v18 }
  0x74   :  { %v46_v23 = vpop.permute.xlu0 %45 }
  0x75   :  { %vm50_vm0 = vcmp.eq.s32.totalorder %v43_v22, %v46_v23 }
  0x76   :  { %1685 = vmatmul.msk.f32.vlgmr.msra.gmra.mxu0 %vm50_vm0, %v1918_v24 }
  0x7c   :  { %v49_v25 = vpop.permute.xlu0 %48 }
  0x7d   :  { %vm51_vm1 = vcmp.eq.s32.totalorder %v43_v22, %v49_v25 }
  0x7e   :  { %1686 = vmatmul.msk.f32.gmra.mxu0 %vm51_vm1, %v1918_v24 }
  0xf3   :  { %v90_v29 = vpop.f32.mrf.mxu0 }
  0xf4   :  { %v2054_v30 = vadd.f32 %v90_v29, %v72_v28 }
  0xf6   :  { %1687 = vmatmul.msk.f32.vlgmr.msra.gmra.mxu1 %vm120_vm2, %v2054_v30 }
  0xfb   :  { %v93_v31 = vpop.f32.mrf.mxu0 }
  0xfc   :  { %v2058_v32 = vadd.f32 %v93_v31, %v72_v28 }
  0xfe   :  { %1688 = vmatmul.msk.f32.gmra.mxu1 %vm120_vm2, %v2058_v32 }
 0x173   :  { %v144_v35 = vpop.f32.mrf.mxu1 }
 0x174   :  { %v145_v36 = vadd.f32 %v144_v35, %v119_v34 }
 0x176   :  { %156 = vrot.lane.b32.xlu0 %v145_v36, %s1919_s2  ;;  %160 = vrot.lane.b32.xlu2 %v145_v36, %s1920_s24 }
 0x17b   :  { %v147_v37 = vpop.f32.mrf.mxu1 }
 0x17c   :  { %v148_v38 = vadd.f32 %v147_v37, %v119_v34 }
 0x17e   :  { %164 = vrot.lane.b32.xlu0 %v145_v36, %s1921_s25  ;;  %154 = vrot.lane.b32.xlu2 %v148_v38, %s1922_s26  ;;  %v1794_v47 = vpack.i.bf16 %v145_v36, %v148_v38 }
 0x17f   :  { %162 = vrot.lane.b32.xlu1 %v148_v38, %s1920_s24 }
 0x186   :  { %166 = vrot.lane.b32.xlu2 %v148_v38, %s1921_s25 }
 0x187   :  { %158 = vrot.lane.b32.xlu1 %v148_v38, %s1919_s2 }
 0x18f   :  { %152 = vrot.lane.b32.xlu1 %v145_v36, %s1922_s26 }
 0x1d0   :  { %v2076_v39 = vpop.permute.xlu2 %160 }
 0x1d1   :  { %270 = vrot.lane.b32.xlu0 %v2076_v39, %s1921_s25 }
 0x1d8   :  { %v2080_v40 = vpop.permute.xlu2 %154 }
 0x1e0   :  { %v167_v41 = vpop.permute.xlu2 %166 }
 0x1e1   :  { %1689 = vmatpush.xpose.msk.msra.mxu2 %vm168_vm3, %v167_v41 }
 0x1e8   :  { %v2083_v42 = vpop.permute.xlu0 %156 }
 0x1f0   :  { %v165_v43 = vpop.permute.xlu0 %164 }
 0x1f1   :  { %v2085_v44 = vpop.permute.xlu1 %162  ;;  %1690 = vmatpush.xpose.msk.msra.mxu2 %vm168_vm3, %v165_v43 }
 0x1f2   :  { %272 = vrot.lane.b32.xlu1 %v2085_v44, %s1921_s25  ;;  %v1804_v41 = vpack.i.bf16 %v2076_v39, %v2085_v44 }
 0x1f4   :  { %1691 = vmatmul.msk.f32.vlgmr.msra.gmra.mxu2 %vm168_vm3, %v145_v36 }
 0x1f9   :  { %v2091_v45 = vpop.permute.xlu1 %158 }
 0x1fa   :  { %202 = vrot.lane.b32.xlu1 %v2080_v40, %s1921_s25  ;;  %237 = vrot.lane.b32.xlu2 %v2091_v45, %s1921_s25 }
 0x1fc   :  { %1692 = vmatmul.msk.f32.gmra.mxu2 %vm168_vm3, %v148_v38 }
 0x201   :  { %v2098_v46 = vpop.permute.xlu1 %152 }
 0x202   :  { %200 = vrot.lane.b32.xlu0 %v2098_v46, %s1921_s25  ;;  %235 = vrot.lane.b32.xlu2 %v2083_v42, %s1921_s25 }
 0x20a   :  { %1795 = vrot.lane.b32.xlu0 %v1794_v47, %s1923_s27 }
 0x243   :  { %v271_v51 = vpop.permute.xlu0 %270 }
 0x254   :  { %v238_v48 = vpop.permute.xlu2 %237 }
 0x255   :  { %1697 = vmatpush.xpose.msk.msrb.mxu1 %vm168_vm3, %v238_v48 }
 0x25c   :  { %v236_v49 = vpop.permute.xlu2 %235 }
 0x25d   :  { %1698 = vmatpush.xpose.msk.msrb.mxu1 %vm168_vm3, %v236_v49 }
 0x260   :  { %1699 = vmatmul.msk.f32.vlgmr.msrb.gmra.mxu1 %vm168_vm3, %v2083_v42 }
 0x264   :  { %v273_v50 = vpop.permute.xlu1 %272 }
 0x265   :  { %1701 = vmatpush.xpose.msk.msrb.mxu2 %vm168_vm3, %v273_v50 }
 0x268   :  { %1700 = vmatmul.msk.f32.gmra.mxu1 %vm168_vm3, %v2091_v45 }
 0x269   :  { %1702 = vmatpush.xpose.msk.msrb.mxu2 %vm168_vm3, %v271_v51 }
 0x26c   :  { %v203_v52 = vpop.permute.xlu1 %202  ;;  %1703 = vmatmul.msk.f32.vlgmr.msrb.gmra.mxu2 %vm168_vm3, %v2076_v39 }
 0x26d   :  { %1693 = vmatpush.xpose.msk.msra.mxu3 %vm168_vm3, %v203_v52 }
 0x274   :  { %1704 = vmatmul.msk.f32.gmra.mxu2 %vm168_vm3, %v2085_v44  ;;  %v201_v53 = vpop.permute.xlu0 %200 }
 0x275   :  { %1694 = vmatpush.xpose.msk.msra.mxu3 %vm168_vm3, %v201_v53 }
 0x277   :  { %v194_v54 = vpop.f32.mrf.mxu2 }
 0x278   :  { %v305_v56 = vmul.f32 0.35355338, %v194_v54  ;;  %1695 = vmatmul.msk.f32.vlgmr.msra.gmra.mxu3 %vm168_vm3, %v2098_v46 }
 0x27a   :  { %v313_v57 = vadd.f32 %v305_v56, %v2122_v55 }
 0x27c   :  { %v1796_v58 = vpop.permute.xlu0 %1795  ;;  %v322_v59 = vsel %vm321_vm4, %v313_v57, -inf }
 0x27d   :  { %323 = vmax.xlane.f32.xlu1 %v322_v59  ;;  %v1797_v60 = vunpack.i.l.bf16 %v1796_v58  ;;  %v1798_v62 = vunpack.i.h.bf16 %v1796_v58 }
 0x27f   :  { %436 = vmatpush.msrb.mxu3 %v1797_v60  ;;  %v197_v61 = vpop.f32.mrf.mxu2 }
 0x280   :  { %v306_v0 = vmul.f32 0.35355338, %v197_v61  ;;  %1696 = vmatmul.msk.f32.gmra.mxu3 %vm168_vm3, %v2080_v40 }
 0x281   :  { %437 = vmatpush.msrb.mxu3 %v1798_v62 }
 0x282   :  { %v314_v1 = vadd.f32 %v306_v0, %v2131_v63 }
 0x284   :  { %v325_v2 = vsel %vm321_vm4, %v314_v1, -inf }
 0x285   :  { %326 = vmax.xlane.f32.xlu2 %v325_v2 }
 0x2dd   :  { %v264_v3 = vpop.f32.mrf.mxu1 }
 0x2de   :  { %v309_v4 = vmul.f32 0.35355338, %v264_v3 }
 0x2e0   :  { %v317_v5 = vadd.f32 %v309_v4, %v2122_v55 }
 0x2e2   :  { %v334_v6 = vsel %vm321_vm4, %v317_v5, -inf }
 0x2e3   :  { %335 = vmax.xlane.f32.xlu0 %v334_v6 }
 0x2e5   :  { %v267_v7 = vpop.f32.mrf.mxu1 }
 0x2e6   :  { %v310_v8 = vmul.f32 0.35355338, %v267_v7 }
 0x2e8   :  { %v2140_v9 = vadd.f32 %v310_v8, %v2131_v63 }
 0x2ea   :  { %v337_v10 = vsel %vm321_vm4, %v2140_v9, -inf }
 0x2eb   :  { %338 = vmax.xlane.f32.xlu1 %v337_v10 }
 0x2ef   :  { %v299_v11 = vpop.f32.mrf.mxu2 }
 0x2f0   :  { %v311_v12 = vmul.f32 0.35355338, %v299_v11  ;;  %v324_v14 = vpop.xlane.xlu1 %323 }
 0x2f1   :  { %v346_v16 = vsub.f32 %v313_v57, %v324_v14 }
 0x2f2   :  { %v319_v13 = vadd.f32 %v311_v12, %v2122_v55 }
 0x2f3   :  { %v354_v20 = vmul.f32 1.442695, %v346_v16 }
 0x2f4   :  { %v340_v15 = vsel %vm321_vm4, %v319_v13, -inf }
 0x2f5   :  { %341 = vmax.xlane.f32.xlu2 %v340_v15  ;;  %1835 = vpow2.f32 %v354_v20  ;;  %v1809_v20 = vpack.i.bf16 %v2098_v46, %v2080_v40  ;;  %v102_v40 = vld [vmem:[%s2567_s5] sm:$0xff] }
 0x2f6   :  { %571 = vmatpush.msrb.mxu0 %v102_v40 }
 0x2f7   :  { %v302_v17 = vpop.f32.mrf.mxu2 }
 0x2f8   :  { %v312_v18 = vmul.f32 0.35355338, %v302_v17  ;;  %v327_v22 = vpop.xlane.xlu2 %326 }
 0x2f9   :  { %v347_v26 = vsub.f32 %v314_v1, %v327_v22  ;;  %v1799_v1 = vpack.i.bf16 %v2083_v42, %v2091_v45 }
 0x2fa   :  { %v320_v19 = vadd.f32 %v312_v18, %v2131_v63 }
 0x2fb   :  { %v229_v21 = vpop.f32.mrf.mxu3  ;;  %v356_v28 = vmul.f32 1.442695, %v347_v26  ;;  %v1836_v34 = vpop.eup %1835 }
 0x2fc   :  { %v307_v23 = vmul.f32 0.35355338, %v229_v21  ;;  %v343_v24 = vsel %vm321_vm4, %v320_v19, -inf  ;;  %v370_v36 = vsel %vm321_vm4, %v1836_v34, 0.0 }
 0x2fd   :  { %344 = vmax.xlane.f32.xlu0 %v343_v24  ;;  %1837 = vpow2.f32 %v356_v28 }
 0x2fe   :  { %v315_v25 = vadd.f32 %v307_v23, %v2122_v55 }
 0x300   :  { %v328_v27 = vsel %vm321_vm4, %v315_v25, -inf }
 0x301   :  { %329 = vmax.xlane.f32.xlu2 %v328_v27 }
 0x303   :  { %v232_v29 = vpop.f32.mrf.mxu3  ;;  %v1838_v38 = vpop.eup %1837 }
 0x304   :  { %v308_v31 = vmul.f32 0.35355338, %v232_v29  ;;  %v373_v43 = vsel %vm321_vm4, %v1838_v38, 0.0 }
 0x306   :  { %v2151_v35 = vadd.f32 %v308_v31, %v2131_v63 }
 0x308   :  { %v331_v37 = vsel %vm321_vm4, %v2151_v35, -inf }
 0x309   :  { %371 = vadd.xlane.f32.xlu2 %v370_v36  ;;  %332 = vmax.xlane.f32.xlu1 %v331_v37 }
 0x311   :  { %1805 = vrot.lane.b32.xlu0 %v1804_v41, %s1923_s27  ;;  %374 = vadd.xlane.f32.xlu1 %v373_v43 }
 0x356   :  { %v336_v47 = vpop.xlane.xlu0 %335 }
 0x357   :  { %v350_v48 = vsub.f32 %v317_v5, %v336_v47 }
 0x359   :  { %v362_v49 = vmul.f32 1.442695, %v350_v48 }
 0x35b   :  { %1839 = vpow2.f32 %v362_v49 }
 0x35e   :  { %v339_v58 = vpop.xlane.xlu1 %338 }
 0x35f   :  { %v351_v62 = vsub.f32 %v2140_v9, %v339_v58  ;;  %v103_v58 = vld [vmem:[%s2567_s5 + $0x8] sm:$0xff] }
 0x361   :  { %v2160_v50 = vpop.eup %1839  ;;  %v364_v3 = vmul.f32 1.442695, %v351_v62 }
 0x362   :  { %v382_v51 = vsel %vm321_vm4, %v2160_v50, 0.0 }
 0x363   :  { %383 = vadd.xlane.f32.xlu2 %v382_v51 }
 0x368   :  { %v342_v52 = vpop.xlane.xlu2 %341 }
 0x369   :  { %v352_v53 = vsub.f32 %v319_v13, %v342_v52 }
 0x36b   :  { %v366_v54 = vmul.f32 1.442695, %v352_v53 }
 0x36d   :  { %1841 = vpow2.f32 %v366_v54 }
 0x370   :  { %v345_v39 = vpop.xlane.xlu0 %344 }
 0x371   :  { %v353_v44 = vsub.f32 %v320_v19, %v345_v39 }
 0x373   :  { %v2164_v56 = vpop.eup %1841  ;;  %v368_v57 = vmul.f32 1.442695, %v353_v44  ;;  %v104_v44 = vld [vmem:[%s2567_s5 + $0x10] sm:$0xff] }
 0x374   :  { %v330_v59 = vpop.xlane.xlu2 %329  ;;  %v388_v60 = vsel %vm321_vm4, %v2164_v56, 0.0 }
 0x375   :  { %1843 = vpow2.f32 %v368_v57  ;;  %v348_v61 = vsub.f32 %v315_v25, %v330_v59  ;;  %389 = vadd.xlane.f32.xlu1 %v388_v60 }
 0x377   :  { %v358_v0 = vmul.f32 1.442695, %v348_v61 }
 0x379   :  { %1845 = vpow2.f32 %v358_v0 }
 0x37b   :  { %v1844_v2 = vpop.eup %1843  ;;  %1800 = vrot.lane.b32.xlu2 %v1799_v1, %s1923_s27 }
 0x37c   :  { %v372_v4 = vpop.xlane.xlu2 %371  ;;  %v333_v5 = vpop.xlane.xlu1 %332  ;;  %v391_v6 = vsel %vm321_vm4, %v1844_v2, 0.0 }
 0x37d   :  { %1847 = vrcp.f32 %v372_v4  ;;  %392 = vadd.xlane.f32.xlu0 %v391_v6  ;;  %v349_v17 = vsub.f32 %v2151_v35, %v333_v5 }
 0x37e   :  { %1849 = vpow2.f32 %v364_v3 }
 0x37f   :  { %v2173_v7 = vpop.eup %1845  ;;  %v360_v18 = vmul.f32 1.442695, %v349_v17 }
 0x380   :  { %v376_v8 = vsel %vm321_vm4, %v2173_v7, 0.0 }
 0x381   :  { %377 = vadd.xlane.f32.xlu1 %v376_v8 }
 0x383   :  { %v1848_v9 = vpop.eup %1847  ;;  %v1806_v42 = vpop.permute.xlu0 %1805 }
 0x384   :  { %v1807_v45 = vunpack.i.l.bf16 %v1806_v42  ;;  %v375_v10 = vpop.xlane.xlu1 %374  ;;  %v402_v11 = vmul.f32 %v1848_v9, %v1836_v34  ;;  %v1850_v12 = vpop.eup %1849  ;;  %v1808_v13 = vunpack.i.h.bf16 %v1806_v42  ;;  %v680_v9 = vperm.slane %v2065_v33, 1 }
 0x385   :  { %1851 = vrcp.f32 %v375_v10  ;;  %v385_v14 = vsel %vm321_vm4, %v1850_v12, 0.0 }
 0x386   :  { %1705 = vmatmul.msk.f32.vlgmr.msrb.gmra.mxu3 %vm321_vm4, %v402_v11  ;;  %1853 = vpow2.f32 %v360_v18 }
 0x387   :  { %541 = vmatpush.msra.mxu3 %v1807_v45 }
 0x389   :  { %542 = vmatpush.msra.mxu3 %v1808_v13  ;;  %386 = vadd.xlane.f32.xlu1 %v385_v14 }
 0x38b   :  { %v1852_v15 = vpop.eup %1851 }
 0x38c   :  { %v403_v16 = vmul.f32 %v1852_v15, %v1838_v38  ;;  %v1854_v19 = vpop.eup %1853 }
 0x38d   :  { %v379_v21 = vsel %vm321_vm4, %v1854_v19, 0.0 }
 0x38e   :  { %1706 = vmatmul.msk.f32.gmra.mxu3 %vm321_vm4, %v403_v16 }
 0x3a2   :  { %1810 = vrot.lane.b32.xlu1 %v1809_v20, %s1923_s27 }
 0x3a4   :  { %380 = vadd.xlane.f32.xlu2 %v379_v21 }
 0x3d6   :  { %v384_v22 = vpop.xlane.xlu2 %383 }
 0x3d7   :  { %1855 = vrcp.f32 %v384_v22 }
 0x3dd   :  { %v1856_v24 = vpop.eup %1855 }
 0x3de   :  { %v1801_v23 = vpop.permute.xlu2 %1800  ;;  %v406_v27 = vmul.f32 %v1856_v24, %v2160_v50 }
 0x3df   :  { %v1802_v25 = vunpack.i.l.bf16 %v1801_v23  ;;  %v1803_v26 = vunpack.i.h.bf16 %v1801_v23 }
 0x3e1   :  { %506 = vmatpush.msra.mxu2 %v1802_v25 }
 0x3e3   :  { %507 = vmatpush.msra.mxu2 %v1803_v26 }
 0x3e4   :  { %1709 = vmatmul.msk.f32.vlgmr.msra.gmra.mxu2 %vm321_vm4, %v406_v27 }
 0x3e5   :  { %629 = vmatpush.msrb.mxu2 %v104_v44 }
 0x3e8   :  { %v390_v28 = vpop.xlane.xlu1 %389 }
 0x3e9   :  { %1857 = vrcp.f32 %v390_v28  ;;  %v1924_v28 = vmov 32.0  }
 0x3ef   :  { %v1858_v46 = vpop.eup %1857 }
 0x3f0   :  { %v408_v29 = vmul.f32 %v1858_v46, %v2164_v56  ;;  %v393_v31 = vpop.xlane.xlu0 %392  ;;  %v105_v56 = vld [vmem:[%s2567_s5 + $0x18] sm:$0xff] }
 0x3f1   :  { %1859 = vrcp.f32 %v393_v31  ;;  %658 = vmatpush.msrb.mxu3 %v105_v56  ;;  %v117_v56 = vld [vmem:[%s2569_s7 + $0x38] sm:$0xff] }
 0x3f2   :  { %1711 = vmatmul.msk.f32.vlgmr.msra.gmra.mxu3 %vm321_vm4, %v408_v29 }
 0x3f4   :  { %v378_v34 = vpop.xlane.xlu1 %377 }
 0x3f7   :  { %v1860_v35 = vpop.eup %1859 }
 0x3f8   :  { %v409_v36 = vmul.f32 %v1860_v35, %v1844_v2 }
 0x3fa   :  { %1712 = vmatmul.msk.f32.gmra.mxu3 %vm321_vm4, %v409_v36 }
 0x3fc   :  { %v387_v37 = vpop.xlane.xlu1 %386 }
 0x3fd   :  { %1861 = vrcp.f32 %v387_v37 }
 0x3fe   :  { %1863 = vrcp.f32 %v378_v34 }
 0x403   :  { %v1862_v38 = vpop.eup %1861 }
 0x404   :  { %v407_v41 = vmul.f32 %v1862_v38, %v1850_v12  ;;  %v1864_v49 = vpop.eup %1863 }
 0x405   :  { %v404_v53 = vmul.f32 %v1864_v49, %v2173_v7 }
 0x406   :  { %1710 = vmatmul.msk.f32.gmra.mxu2 %vm321_vm4, %v407_v41 }
 0x409   :  { %v439_v43 = vpop.f32.mrf.mxu3 }
 0x40a   :  { %1713 = vmatmul.msk.f32.vlgmr.msrb.gmra.mxu0 %vm168_vm3, %v439_v43 }
 0x411   :  { %v442_v47 = vpop.f32.mrf.mxu3 }
 0x412   :  { %1714 = vmatmul.msk.f32.gmra.mxu0 %vm168_vm3, %v442_v47 }
 0x414   :  { %v1811_v48 = vpop.permute.xlu1 %1810 }
 0x415   :  { %v1812_v50 = vunpack.i.l.bf16 %v1811_v48  ;;  %v1813_v51 = vunpack.i.h.bf16 %v1811_v48 }
 0x417   :  { %471 = vmatpush.msra.mxu1 %v1812_v50  ;;  %v381_v52 = vpop.xlane.xlu2 %380  ;;  %v109_v50 = vld [vmem:[%s2568_s6 + $0x18] sm:$0xff] }
 0x418   :  { %1865 = vrcp.f32 %v381_v52  ;;  %766 = vmatpush.msra.mxu0 %v109_v50  ;;  %v107_v52 = vld [vmem:[%s2568_s6 + $0x8] sm:$0xff] }
 0x419   :  { %472 = vmatpush.msra.mxu1 %v1813_v51  ;;  %1867 = vrcp.f32 %v1924_v28  ;;  %v108_v51 = vld [vmem:[%s2568_s6 + $0x10] sm:$0xff] }
 0x41a   :  { %1707 = vmatmul.msk.f32.vlgmr.msra.gmra.mxu1 %vm321_vm4, %v404_v53  ;;  %767 = vmatpush.msra.mxu0 %v108_v51  ;;  %v106_v53 = vld [vmem:[%s2568_s6] sm:$0xff] }
 0x41b   :  { %600 = vmatpush.msrb.mxu1 %v103_v58  ;;  %v115_v58 = vld [vmem:[%s2569_s7 + $0x28] sm:$0xff] }
 0x41c   :  { %768 = vmatpush.msra.mxu0 %v107_v52 }
 0x41d   :  { %795 = vmatpush.msra.mxu1 %v117_v56 }
 0x41e   :  { %v1866_v54 = vpop.eup %1865  ;;  %769 = vmatpush.msra.mxu0 %v106_v53 }
 0x41f   :  { %v405_v39 = vmul.f32 %v1866_v54, %v1854_v19  ;;  %v1868_v40 = vpop.eup %1867 }
 0x420   :  { %v692_v46 = vmul.f32 32.0, %v1868_v40  ;;  %vm696_vm5 = vweird.f32 %v1868_v40 }
 0x422   :  { %1708 = vmatmul.msk.f32.gmra.mxu1 %vm321_vm4, %v405_v39 }
 0x467   :  { %v509_v57 = vpop.f32.mrf.mxu2 }
 0x468   :  { %1717 = vmatmul.msk.f32.vlgmr.msrb.gmra.mxu2 %vm168_vm3, %v509_v57  ;;  %v116_v57 = vld [vmem:[%s2569_s7 + $0x30] sm:$0xff] }
 0x469   :  { %796 = vmatpush.msra.mxu1 %v116_v57  ;;  %v1726_v57 = vld [vmem:[%s2563_s4 + $0x28] sm:$0xff] }
 0x46b   :  { %797 = vmatpush.msra.mxu1 %v115_v58 }
 0x475   :  { %v544_v59 = vpop.f32.mrf.mxu3 }
 0x476   :  { %1719 = vmatmul.msk.f32.vlgmr.msrb.gmra.mxu3 %vm168_vm3, %v544_v59 }
 0x47d   :  { %v547_v60 = vpop.f32.mrf.mxu3 }
 0x47e   :  { %1720 = vmatmul.msk.f32.gmra.mxu3 %vm168_vm3, %v547_v60 }
 0x487   :  { %v573_v1 = vpop.f32.mrf.mxu0 }
 0x488   :  { %v666_v5 = vsel %vm120_vm2, %v573_v1, 0.0  ;;  %v113_v1 = vld [vmem:[%s2569_s7 + $0x18] sm:$0xff] }
 0x489   :  { %v512_v61 = vpop.f32.mrf.mxu2 }
 0x48a   :  { %1718 = vmatmul.msk.f32.gmra.mxu2 %vm168_vm3, %v512_v61  ;;  %v114_v61 = vld [vmem:[%s2569_s7 + $0x20] sm:$0xff] }
 0x48b   :  { %798 = vmatpush.msra.mxu1 %v114_v61 }
 0x48d   :  { %799 = vmatpush.msra.mxu1 %v113_v1 }
 0x48f   :  { %v576_v10 = vpop.f32.mrf.mxu0 }
 0x490   :  { %v673_v15 = vsel %vm120_vm2, %v576_v10, 0.0 }
 0x497   :  { %v474_v62 = vpop.f32.mrf.mxu1 }
 0x498   :  { %1715 = vmatmul.msk.f32.vlgmr.msrb.gmra.mxu1 %vm168_vm3, %v474_v62 }
 0x49f   :  { %v477_v0 = vpop.f32.mrf.mxu1 }
 0x4a0   :  { %1716 = vmatmul.msk.f32.gmra.mxu1 %vm168_vm3, %v477_v0 }
 0x4eb   :  { %v631_v2 = vpop.f32.mrf.mxu2 }
 0x4ec   :  { %v669_v8 = vsel %vm120_vm2, %v631_v2, 0.0 }
 0x4f9   :  { %v660_v3 = vpop.f32.mrf.mxu3 }
 0x4fa   :  { %v671_v45 = vsel %vm120_vm2, %v660_v3, 0.0 }
 0x501   :  { %v663_v17 = vpop.f32.mrf.mxu3 }
 0x502   :  { %v678_v23 = vsel %vm120_vm2, %v663_v17, 0.0 }
 0x50d   :  { %v634_v12 = vpop.f32.mrf.mxu2 }
 0x50e   :  { %v676_v20 = vsel %vm120_vm2, %v634_v12, 0.0 }
 0x515   :  { %v602_v4 = vpop.f32.mrf.mxu1 }
 0x516   :  { %v667_v6 = vsel %vm120_vm2, %v602_v4, 0.0 }
 0x517   :  { %v668_v7 = vadd.f32 %v667_v6, %v666_v5 }
 0x519   :  { %v670_v42 = vadd.f32 %v669_v8, %v668_v7 }
 0x51b   :  { %v672_v11 = vadd.f32 %v671_v45, %v670_v42 }
 0x51d   :  { %v605_v13 = vpop.f32.mrf.mxu1  ;;  %v681_v14 = vadd.f32 %v680_v9, %v672_v11 }
 0x51e   :  { %v674_v16 = vsel %vm120_vm2, %v605_v13, 0.0 }
 0x51f   :  { %v675_v18 = vadd.f32 %v674_v16, %v673_v15  ;;  %v683_v19 = vadd.f32 %v681_v14, %v2054_v30  ;;  %v693_v30 = vsub.f32 1.0, %v692_v46 }
 0x521   :  { %v677_v21 = vadd.f32 %v676_v20, %v675_v18  ;;  %v685_v22 = vsel %vm120_vm2, %v683_v19, 0.0  ;;  %v694_v29 = vmul.f32 %v1868_v40, %v693_v30  ;;  %v779_v30 = vperm.slane %v2065_v33, 3 }
 0x522   :  { %686 = vadd.xlane.f32.xlu1 %v685_v22  ;;  %v111_v22 = vld [vmem:[%s2569_s7 + $0x8] sm:$0xff] }
 0x523   :  { %v679_v24 = vadd.f32 %v678_v23, %v677_v21  ;;  %v695_v31 = vadd.f32 %v1868_v40, %v694_v29  ;;  %v112_v21 = vld [vmem:[%s2569_s7 + $0x10] sm:$0xff]  ;;  %v110_v23 = vld [vmem:[%s2569_s7] sm:$0xff] }
 0x524   :  { %800 = vmatpush.msra.mxu1 %v112_v21  ;;  %v2312_v21 = vld [vmem:[%s2565_s8 + $0x4] sm:$0xf] }
 0x525   :  { %v682_v25 = vadd.f32 %v680_v9, %v679_v24  ;;  %v2227_v34 = vsel %vm696_vm5, %v1868_v40, %v695_v31  ;;  %v747_v24 = vperm.slane %v2065_v33, 2 }
 0x526   :  { %801 = vmatpush.msra.mxu1 %v111_v22  ;;  %v893_v22 = vperm.slane %v2312_v21, 0 }
 0x527   :  { %v684_v26 = vadd.f32 %v682_v25, %v2058_v32 }
 0x528   :  { %802 = vmatpush.msra.mxu1 %v110_v23 }
 0x529   :  { %v688_v27 = vsel %vm120_vm2, %v684_v26, 0.0 }
 0x52a   :  { %689 = vadd.xlane.f32.xlu0 %v688_v27 }
 0x595   :  { %v687_v35 = vpop.xlane.xlu1 %686 }
 0x596   :  { %v698_v36 = vmul.f32 %v2227_v34, %v687_v35 }
 0x598   :  { %v700_v37 = vsub.f32 %v683_v19, %v698_v36 }
 0x59a   :  { %v702_v38 = vmul.f32 %v700_v37, %v700_v37 }
 0x59c   :  { %v704_v32 = vsel %vm120_vm2, %v702_v38, 0.0 }
 0x59d   :  { %705 = vadd.xlane.f32.xlu0 %v704_v32  ;;  %v690_v41 = vpop.xlane.xlu0 %689 }
 0x59e   :  { %v699_v43 = vmul.f32 %v2227_v34, %v690_v41 }
 0x5a0   :  { %v701_v47 = vsub.f32 %v684_v26, %v699_v43 }
 0x5a2   :  { %v703_v48 = vmul.f32 %v701_v47, %v701_v47 }
 0x5a4   :  { %v707_v49 = vsel %vm120_vm2, %v703_v48, 0.0 }
 0x5a5   :  { %708 = vadd.xlane.f32.xlu2 %v707_v49 }
 0x5b1   :  { %737 = vrot.lane.b32.xlu0 %v680_v9, %s1921_s25 }
 0x5bd   :  { %742 = vrot.lane.b32.xlu2 %v680_v9, %s1923_s27 }
 0x610   :  { %v706_v54 = vpop.xlane.xlu0 %705 }
 0x611   :  { %v710_v39 = vmul.f32 %v706_v54, %v2227_v34 }
 0x613   :  { %v712_v44 = vadd.f32 1e-05, %v710_v39  ;;  %v1728_v39 = vld [vmem:[%s2563_s4 + $0x38] sm:$0xff] }
 0x614   :  { %912 = vmatpush.msra.mxu2 %v1728_v39 }
 0x615   :  { %1869 = vrsqrt.f32 %v712_v44  ;;  %vm720_vm7 = vweird.f32 %v712_v44 }
 0x618   :  { %v709_v59 = vpop.xlane.xlu2 %708 }
 0x619   :  { %v711_v60 = vmul.f32 %v709_v59, %v2227_v34  ;;  %v1725_v59 = vld [vmem:[%s2563_s4 + $0x20] sm:$0xff] }
 0x61b   :  { %v1870_v62 = vpop.eup %1869  ;;  %v713_v0 = vadd.f32 1e-05, %v711_v60 }
 0x61c   :  { %v715_v2 = vmul.f32 %v1870_v62, %v712_v44  ;;  %vm721_vm6 = vweird.f32 %v1870_v62  ;;  %v1727_v44 = vld [vmem:[%s2563_s4 + $0x30] sm:$0xff] }
 0x61d   :  { %1871 = vrsqrt.f32 %v713_v0  ;;  %vm722_vm8 = vmor %vm720_vm7, %vm721_vm6  ;;  %vm730_vm10 = vweird.f32 %v713_v0  ;;  %913 = vmatpush.msra.mxu2 %v1727_v44 }
 0x61e   :  { %v716_v3 = vmul.f32 %v1870_v62, %v715_v2 }
 0x61f   :  { %914 = vmatpush.msra.mxu2 %v1726_v57 }
 0x620   :  { %v717_v4 = vmul.f32 0.5, %v716_v3  ;;  %v743_v12 = vpop.permute.xlu2 %742 }
 0x621   :  { %915 = vmatpush.msra.mxu2 %v1725_v59 }
 0x622   :  { %v718_v5 = vsub.f32 1.5, %v717_v4 }
 0x623   :  { %v1872_v6 = vpop.eup %1871  ;;  %v738_v45 = vpop.permute.xlu0 %737 }
 0x624   :  { %v725_v7 = vmul.f32 %v1872_v6, %v713_v0  ;;  %v719_v8 = vmul.f32 %v1870_v62, %v718_v5  ;;  %vm731_vm9 = vweird.f32 %v1872_v6 }
 0x625   :  { %vm732_vm11 = vmor %vm730_vm10, %vm731_vm9 }
 0x626   :  { %v726_v9 = vmul.f32 %v1872_v6, %v725_v7  ;;  %v723_v42 = vsel %vm722_vm8, %v1870_v62, %v719_v8 }
 0x627   :  { %v734_v10 = vmul.f32 %v723_v42, %v700_v37 }
 0x628   :  { %v727_v11 = vmul.f32 0.5, %v726_v9 }
 0x629   :  { %v740_v13 = vmul.f32 %v738_v45, %v734_v10 }
 0x62a   :  { %v728_v14 = vsub.f32 1.5, %v727_v11 }
 0x62b   :  { %v745_v15 = vadd.f32 %v743_v12, %v740_v13 }
 0x62c   :  { %v729_v16 = vmul.f32 %v1872_v6, %v728_v14 }
 0x62d   :  { %1721 = vmatmul.msk.f32.vlgmr.msra.gmra.mxu0 %vm120_vm2, %v745_v15 }
 0x62e   :  { %v733_v17 = vsel %vm732_vm11, %v1872_v6, %v729_v16 }
 0x62f   :  { %v735_v18 = vmul.f32 %v733_v17, %v701_v47 }
 0x631   :  { %v741_v19 = vmul.f32 %v738_v45, %v735_v18 }
 0x633   :  { %v746_v20 = vadd.f32 %v743_v12, %v741_v19 }
 0x635   :  { %1722 = vmatmul.msk.f32.gmra.mxu0 %vm120_vm2, %v746_v20 }
 0x6aa   :  { %v771_v25 = vpop.f32.mrf.mxu0 }
 0x6ab   :  { %v772_v26 = vadd.f32 %v771_v25, %v747_v24 }
 0x6ad   :  { %v777_v27 = vmax.f32 %v772_v26, 0.0 }
 0x6af   :  { %1723 = vmatmul.msk.f32.vlgmr.msra.gmra.mxu1 %vm780_vm12, %v777_v27 }
 0x6b2   :  { %v774_v28 = vpop.f32.mrf.mxu0 }
 0x6b3   :  { %v775_v40 = vadd.f32 %v774_v28, %v747_v24 }
 0x6b5   :  { %v778_v46 = vmax.f32 %v775_v40, 0.0 }
 0x6b7   :  { %1724 = vmatmul.msk.f32.gmra.mxu1 %vm780_vm12, %v778_v46 }
 0x72c   :  { %v804_v29 = vpop.f32.mrf.mxu1 }
 0x72d   :  { %v805_v31 = vadd.f32 %v804_v29, %v779_v30 }
 0x72f   :  { %v810_v35 = vadd.f32 %v805_v31, %v745_v15 }
 0x731   :  { %v812_v36 = vsel %vm120_vm2, %v810_v35, 0.0 }
 0x732   :  { %813 = vadd.xlane.f32.xlu1 %v812_v36 }
 0x734   :  { %v807_v37 = vpop.f32.mrf.mxu1 }
 0x735   :  { %v808_v38 = vadd.f32 %v807_v37, %v779_v30 }
 0x737   :  { %v811_v32 = vadd.f32 %v808_v38, %v746_v20 }
 0x739   :  { %v815_v41 = vsel %vm120_vm2, %v811_v32, 0.0 }
 0x73a   :  { %816 = vadd.xlane.f32.xlu0 %v815_v41 }
 0x7a5   :  { %v814_v43 = vpop.xlane.xlu1 %813 }
 0x7a6   :  { %v818_v47 = vmul.f32 %v814_v43, %v2227_v34 }
 0x7a8   :  { %v820_v48 = vsub.f32 %v810_v35, %v818_v47 }
 0x7aa   :  { %v822_v49 = vmul.f32 %v820_v48, %v820_v48 }
 0x7ac   :  { %v824_v50 = vsel %vm120_vm2, %v822_v49, 0.0 }
 0x7ad   :  { %v817_v33 = vpop.xlane.xlu0 %816  ;;  %825 = vadd.xlane.f32.xlu1 %v824_v50 }
 0x7ae   :  { %v819_v51 = vmul.f32 %v817_v33, %v2227_v34 }
 0x7b0   :  { %v821_v52 = vsub.f32 %v811_v32, %v819_v51 }
 0x7b2   :  { %v823_v53 = vmul.f32 %v821_v52, %v821_v52 }
 0x7b4   :  { %v827_v54 = vsel %vm120_vm2, %v823_v53, 0.0 }
 0x7b5   :  { %828 = vadd.xlane.f32.xlu2 %v827_v54 }
 0x7c6   :  { %857 = vrot.lane.b32.xlu1 %v779_v30, %s1921_s25 }
 0x7ce   :  { %862 = vrot.lane.b32.xlu1 %v779_v30, %s1923_s27 }
 0x820   :  { %v826_v56 = vpop.xlane.xlu1 %825 }
 0x821   :  { %v830_v58 = vmul.f32 %v826_v56, %v2227_v34 }
 0x823   :  { %v832_v60 = vadd.f32 1e-05, %v830_v58 }
 0x825   :  { %1873 = vrsqrt.f32 %v832_v60  ;;  %vm840_vm14 = vweird.f32 %v832_v60 }
 0x828   :  { %v829_v61 = vpop.xlane.xlu2 %828 }
 0x829   :  { %v831_v62 = vmul.f32 %v829_v61, %v2227_v34 }
 0x82b   :  { %v1874_v0 = vpop.eup %1873  ;;  %v833_v1 = vadd.f32 1e-05, %v831_v62 }
 0x82c   :  { %v835_v2 = vmul.f32 %v1874_v0, %v832_v60  ;;  %vm841_vm13 = vweird.f32 %v1874_v0 }
 0x82d   :  { %1875 = vrsqrt.f32 %v833_v1  ;;  %vm842_vm15 = vmor %vm840_vm14, %vm841_vm13  ;;  %vm850_vm1 = vweird.f32 %v833_v1 }
 0x82e   :  { %v836_v3 = vmul.f32 %v1874_v0, %v835_v2 }
 0x830   :  { %v837_v4 = vmul.f32 0.5, %v836_v3 }
 0x832   :  { %v838_v5 = vsub.f32 1.5, %v837_v4 }
 0x833   :  { %v1876_v6 = vpop.eup %1875 }
 0x834   :  { %v845_v7 = vmul.f32 %v1876_v6, %v833_v1  ;;  %v839_v8 = vmul.f32 %v1874_v0, %v838_v5  ;;  %vm851_vm0 = vweird.f32 %v1876_v6 }
 0x835   :  { %vm852_vm5 = vmor %vm850_vm1, %vm851_vm0  ;;  %vm1644_vm0 = vcmask 1040384   ;;  %vm1677_vm1 = vcmask 1024  }
 0x836   :  { %v846_v9 = vmul.f32 %v1876_v6, %v845_v7  ;;  %v843_v45 = vsel %vm842_vm15, %v1874_v0, %v839_v8 }
 0x837   :  { %v854_v12 = vmul.f32 %v843_v45, %v820_v48 }
 0x838   :  { %v847_v42 = vmul.f32 0.5, %v846_v9  ;;  %v858_v10 = vpop.permute.xlu1 %857 }
 0x839   :  { %v860_v15 = vmul.f32 %v858_v10, %v854_v12 }
 0x83a   :  { %v848_v11 = vsub.f32 1.5, %v847_v42 }
 0x83c   :  { %v849_v13 = vmul.f32 %v1876_v6, %v848_v11 }
 0x83e   :  { %v853_v14 = vsel %vm852_vm5, %v1876_v6, %v849_v13 }
 0x83f   :  { %v855_v17 = vmul.f32 %v853_v14, %v821_v52 }
 0x840   :  { %v863_v16 = vpop.permute.xlu1 %862 }
 0x841   :  { %v2301_v18 = vadd.f32 %v863_v16, %v860_v15  ;;  %v861_v19 = vmul.f32 %v858_v10, %v855_v17 }
 0x843   :  { %1746 = vmatmul.msk.f32.vlgmr.msra.gmra.mxu2 %vm120_vm2, %v2301_v18  ;;  %v2305_v20 = vadd.f32 %v863_v16, %v861_v19 }
 0x84b   :  { %1747 = vmatmul.msk.f32.gmra.mxu2 %vm120_vm2, %v2305_v20 }
 0x8c6   :  { %v917_v23 = vpop.f32.mrf.mxu2 }
 0x8c7   :  { %v2315_v24 = vadd.f32 %v917_v23, %v893_v22 }
 0x8c9   :  { %933 = vrot.lane.b32.xlu1 %v2315_v24, %s1920_s24 }
 0x8ce   :  { %v920_v25 = vpop.f32.mrf.mxu2 }
 0x8cf   :  { %v2319_v26 = vadd.f32 %v920_v25, %v893_v22 }
 0x8d1   :  { %927 = vrot.lane.b32.xlu2 %v2319_v26, %s1922_s26  ;;  %935 = vrot.lane.b32.xlu0 %v2319_v26, %s1920_s24  ;;  %v1814_v23 = vpack.i.bf16 %v2315_v24, %v2319_v26 }
 0x8d2   :  { %931 = vrot.lane.b32.xlu1 %v2319_v26, %s1919_s2 }
 0x8d9   :  { %929 = vrot.lane.b32.xlu0 %v2315_v24, %s1919_s2 }
 0x8da   :  { %925 = vrot.lane.b32.xlu1 %v2315_v24, %s1922_s26 }
 0x8e1   :  { %937 = vrot.lane.b32.xlu0 %v2315_v24, %s1921_s25 }
 0x8e2   :  { %939 = vrot.lane.b32.xlu1 %v2319_v26, %s1921_s25 }
 0x92b   :  { %v2335_v27 = vpop.permute.xlu2 %927 }
 0x92c   :  { %974 = vrot.lane.b32.xlu0 %v2335_v27, %s1921_s25 }
 0x93b   :  { %v2339_v28 = vpop.permute.xlu1 %933 }
 0x93c   :  { %1042 = vrot.lane.b32.xlu1 %v2339_v28, %s1921_s25 }
 0x943   :  { %v2343_v40 = vpop.permute.xlu0 %935 }
 0x944   :  { %v2345_v46 = vpop.permute.xlu1 %931  ;;  %1044 = vrot.lane.b32.xlu2 %v2343_v40, %s1921_s25 }
 0x94b   :  { %v2349_v30 = vpop.permute.xlu0 %929 }
 0x94c   :  { %v2351_v29 = vpop.permute.xlu1 %925  ;;  %1007 = vrot.lane.b32.xlu0 %v2349_v30, %s1921_s25  ;;  %1009 = vrot.lane.b32.xlu2 %v2345_v46, %s1921_s25 }
 0x94d   :  { %972 = vrot.lane.b32.xlu1 %v2351_v29, %s1921_s25 }
 0x953   :  { %v938_v35 = vpop.permute.xlu0 %937 }
 0x954   :  { %v940_v31 = vpop.permute.xlu1 %939 }
 0x955   :  { %1748 = vmatpush.xpose.msk.msra.mxu3 %vm168_vm3, %v940_v31 }
 0x959   :  { %1749 = vmatpush.xpose.msk.msra.mxu3 %vm168_vm3, %v938_v35 }
 0x95c   :  { %1750 = vmatmul.msk.f32.vlgmr.msra.gmra.mxu3 %vm168_vm3, %v2315_v24 }
 0x964   :  { %1751 = vmatmul.msk.f32.gmra.mxu3 %vm168_vm3, %v2319_v26 }
 0x99e   :  { %v1045_v36 = vpop.permute.xlu2 %1044  ;;  %v975_v37 = vpop.permute.xlu0 %974 }
 0x99f   :  { %1752 = vmatpush.xpose.msk.msrb.mxu0 %vm168_vm3, %v975_v37  ;;  %1760 = vmatpush.xpose.msk.msrb.mxu2 %vm168_vm3, %v1045_v36 }
 0x9a6   :  { %v1010_v38 = vpop.permute.xlu2 %1009 }
 0x9a7   :  { %1756 = vmatpush.xpose.msk.msrb.mxu1 %vm168_vm3, %v1010_v38 }
 0x9ae   :  { %v1043_v32 = vpop.permute.xlu1 %1042 }
 0x9af   :  { %1761 = vmatpush.xpose.msk.msrb.mxu2 %vm168_vm3, %v1043_v32 }
 0x9b2   :  { %1762 = vmatmul.msk.f32.vlgmr.msrb.gmra.mxu2 %vm168_vm3, %v2339_v28 }
 0x9ba   :  { %1763 = vmatmul.msk.f32.gmra.mxu2 %vm168_vm3, %v2343_v40 }
 0x9be   :  { %v1008_v41 = vpop.permute.xlu0 %1007 }
 0x9bf   :  { %v973_v43 = vpop.permute.xlu1 %972  ;;  %1757 = vmatpush.xpose.msk.msrb.mxu1 %vm168_vm3, %v1008_v41 }
 0x9c0   :  { %1753 = vmatpush.xpose.msk.msrb.mxu0 %vm168_vm3, %v973_v43 }
 0x9c2   :  { %1758 = vmatmul.msk.f32.vlgmr.msrb.gmra.mxu1 %vm168_vm3, %v2349_v30 }
 0x9c3   :  { %1754 = vmatmul.msk.f32.vlgmr.msrb.gmra.mxu0 %vm168_vm3, %v2351_v29 }
 0x9ca   :  { %1759 = vmatmul.msk.f32.gmra.mxu1 %vm168_vm3, %v2345_v46 }
 0x9cb   :  { %1755 = vmatmul.msk.f32.gmra.mxu0 %vm168_vm3, %v2335_v27 }
 0x9df   :  { %v966_v47 = vpop.f32.mrf.mxu3 }
 0x9e0   :  { %v1077_v48 = vmul.f32 0.35355338, %v966_v47 }
 0x9e2   :  { %v1085_v49 = vadd.f32 %v1077_v48, %v2122_v55 }
 0x9e4   :  { %v1093_v50 = vsel %vm321_vm4, %v1085_v49, -inf }
 0x9e5   :  { %1094 = vmax.xlane.f32.xlu2 %v1093_v50 }
 0x9e7   :  { %v969_v33 = vpop.f32.mrf.mxu3 }
 0x9e8   :  { %v1078_v51 = vmul.f32 0.35355338, %v969_v33 }
 0x9ea   :  { %v1086_v52 = vadd.f32 %v1078_v51, %v2131_v63  ;;  %v1819_v51 = vpack.i.bf16 %v2339_v28, %v2343_v40 }
 0x9ec   :  { %v1096_v53 = vsel %vm321_vm4, %v1086_v52, -inf }
 0x9ed   :  { %1097 = vmax.xlane.f32.xlu0 %v1096_v53 }
 0xa35   :  { %v1071_v54 = vpop.f32.mrf.mxu2 }
 0xa36   :  { %v1083_v39 = vmul.f32 0.35355338, %v1071_v54 }
 0xa38   :  { %v1091_v44 = vadd.f32 %v1083_v39, %v2122_v55 }
 0xa3a   :  { %v1111_v56 = vsel %vm321_vm4, %v1091_v44, -inf }
 0xa3b   :  { %1112 = vmax.xlane.f32.xlu1 %v1111_v56 }
 0xa3d   :  { %v1074_v5 = vpop.f32.mrf.mxu2 }
 0xa3e   :  { %v1084_v9 = vmul.f32 0.35355338, %v1074_v5 }
 0xa3f   :  { %v1036_v57 = vpop.f32.mrf.mxu1 }
 0xa40   :  { %v1001_v58 = vpop.f32.mrf.mxu0  ;;  %v1081_v59 = vmul.f32 0.35355338, %v1036_v57  ;;  %v2404_v45 = vadd.f32 %v1084_v9, %v2131_v63 }
 0xa41   :  { %v1079_v60 = vmul.f32 0.35355338, %v1001_v58 }
 0xa42   :  { %v1089_v61 = vadd.f32 %v1081_v59, %v2122_v55  ;;  %v1114_v10 = vsel %vm321_vm4, %v2404_v45, -inf }
 0xa43   :  { %v1087_v62 = vadd.f32 %v1079_v60, %v2122_v55 }
 0xa44   :  { %v1105_v0 = vsel %vm321_vm4, %v1089_v61, -inf }
 0xa45   :  { %1106 = vmax.xlane.f32.xlu0 %v1105_v0  ;;  %v1099_v1 = vsel %vm321_vm4, %v1087_v62, -inf }
 0xa46   :  { %1100 = vmax.xlane.f32.xlu2 %v1099_v1 }
 0xa47   :  { %v1039_v2 = vpop.f32.mrf.mxu1 }
 0xa48   :  { %v1004_v3 = vpop.f32.mrf.mxu0  ;;  %v1082_v4 = vmul.f32 0.35355338, %v1039_v2 }
 0xa49   :  { %v1080_v6 = vmul.f32 0.35355338, %v1004_v3 }
 0xa4a   :  { %v2394_v7 = vadd.f32 %v1082_v4, %v2131_v63  ;;  %v1829_v4 = vpack.i.bf16 %v2349_v30, %v2345_v46 }
 0xa4b   :  { %v2397_v8 = vadd.f32 %v1080_v6, %v2131_v63 }
 0xa4c   :  { %v1108_v55 = vsel %vm321_vm4, %v2394_v7, -inf }
 0xa4d   :  { %1109 = vmax.xlane.f32.xlu1 %v1108_v55  ;;  %v1102_v42 = vsel %vm321_vm4, %v2397_v8, -inf }
 0xa4e   :  { %1103 = vmax.xlane.f32.xlu2 %v1102_v42 }
 0xa55   :  { %1115 = vmax.xlane.f32.xlu1 %v1114_v10 }
 0xa58   :  { %v1095_v11 = vpop.xlane.xlu2 %1094 }
 0xa59   :  { %v1117_v12 = vsub.f32 %v1085_v49, %v1095_v11 }
 0xa5b   :  { %v1125_v13 = vmul.f32 1.442695, %v1117_v12 }
 0xa5d   :  { %1877 = vpow2.f32 %v1125_v13 }
 0xa60   :  { %v1098_v14 = vpop.xlane.xlu0 %1097 }
 0xa61   :  { %v1118_v15 = vsub.f32 %v1086_v52, %v1098_v14  ;;  %v1824_v52 = vpack.i.bf16 %v2351_v29, %v2335_v27 }
 0xa63   :  { %v1878_v16 = vpop.eup %1877  ;;  %v1127_v17 = vmul.f32 1.442695, %v1118_v15 }
 0xa64   :  { %v1141_v19 = vsel %vm321_vm4, %v1878_v16, 0.0 }
 0xa65   :  { %1879 = vpow2.f32 %v1127_v17  ;;  %1142 = vadd.xlane.f32.xlu0 %v1141_v19 }
 0xa6b   :  { %v1880_v22 = vpop.eup %1879 }
 0xa6c   :  { %v1144_v63 = vsel %vm321_vm4, %v1880_v22, 0.0 }
 0xa6d   :  { %1145 = vadd.xlane.f32.xlu0 %v1144_v63 }
 0xa6e   :  { %1815 = vrot.lane.b32.xlu1 %v1814_v23, %s1923_s27 }
 0xaae   :  { %v1113_v25 = vpop.xlane.xlu1 %1112 }
 0xaaf   :  { %v1123_v31 = vsub.f32 %v1091_v44, %v1113_v25 }
 0xab1   :  { %v1137_v35 = vmul.f32 1.442695, %v1123_v31 }
 0xab3   :  { %1881 = vpow2.f32 %v1137_v35 }
 0xab8   :  { %v1107_v36 = vpop.xlane.xlu0 %1106 }
 0xab9   :  { %v1882_v37 = vpop.eup %1881  ;;  %v1121_v38 = vsub.f32 %v1089_v61, %v1107_v36  ;;  %v1101_v32 = vpop.xlane.xlu2 %1100 }
 0xaba   :  { %v1119_v41 = vsub.f32 %v1087_v62, %v1101_v32  ;;  %v1159_v43 = vsel %vm321_vm4, %v1882_v37, 0.0 }
 0xabb   :  { %v1133_v47 = vmul.f32 1.442695, %v1121_v38  ;;  %1160 = vadd.xlane.f32.xlu2 %v1159_v43 }
 0xabc   :  { %v1129_v48 = vmul.f32 1.442695, %v1119_v41 }
 0xabd   :  { %1883 = vpow2.f32 %v1133_v47  ;;  %v1732_v47 = vld [vmem:[%s2567_s5 + $0x38] sm:$0xff] }
 0xabe   :  { %1885 = vpow2.f32 %v1129_v48  ;;  %v1730_v48 = vld [vmem:[%s2567_s5 + $0x28] sm:$0xff] }
 0xac0   :  { %v1110_v33 = vpop.xlane.xlu1 %1109 }
 0xac1   :  { %v1104_v28 = vpop.xlane.xlu2 %1103  ;;  %v1122_v6 = vsub.f32 %v2394_v7, %v1110_v33  ;;  %v1729_v7 = vld [vmem:[%s2567_s5 + $0x20] sm:$0xff] }
 0xac2   :  { %v1120_v27 = vsub.f32 %v2397_v8, %v1104_v28 }
 0xac3   :  { %v2414_v24 = vpop.eup %1883  ;;  %v1135_v8 = vmul.f32 1.442695, %v1122_v6 }
 0xac4   :  { %v2416_v26 = vpop.eup %1885  ;;  %v1153_v49 = vsel %vm321_vm4, %v2414_v24, 0.0  ;;  %v1131_v60 = vmul.f32 1.442695, %v1120_v27 }
 0xac5   :  { %1154 = vadd.xlane.f32.xlu1 %v1153_v49  ;;  %v1147_v50 = vsel %vm321_vm4, %v2416_v26, 0.0 }
 0xac6   :  { %1148 = vadd.xlane.f32.xlu0 %v1147_v50 }
 0xac8   :  { %v1116_v53 = vpop.xlane.xlu1 %1115 }
 0xac9   :  { %v1124_v61 = vsub.f32 %v2404_v45, %v1116_v53 }
 0xacb   :  { %v1139_v62 = vmul.f32 1.442695, %v1124_v61 }
 0xad3   :  { %1820 = vrot.lane.b32.xlu2 %v1819_v51, %s1923_s27  ;;  %v1731_v51 = vld [vmem:[%s2567_s5 + $0x30] sm:$0xff] }
 0xad8   :  { %v1143_v54 = vpop.xlane.xlu0 %1142 }
 0xad9   :  { %1887 = vrcp.f32 %v1143_v54 }
 0xada   :  { %1825 = vrot.lane.b32.xlu0 %v1824_v52, %s1923_s27 }
 0xadf   :  { %v1888_v56 = vpop.eup %1887 }
 0xae0   :  { %v1146_v39 = vpop.xlane.xlu0 %1145  ;;  %v1816_v44 = vpop.permute.xlu1 %1815  ;;  %v1173_v59 = vmul.f32 %v1888_v56, %v1878_v16 }
 0xae1   :  { %v1817_v57 = vunpack.i.l.bf16 %v1816_v44  ;;  %1889 = vrcp.f32 %v1146_v39  ;;  %v1818_v58 = vunpack.i.h.bf16 %v1816_v44 }
 0xae2   :  { %1891 = vpow2.f32 %v1131_v60 }
 0xae3   :  { %1207 = vmatpush.msrb.mxu3 %v1817_v57  ;;  %1893 = vpow2.f32 %v1139_v62 }
 0xae5   :  { %1208 = vmatpush.msrb.mxu3 %v1818_v58 }
 0xae6   :  { %1764 = vmatmul.msk.f32.vlgmr.msrb.gmra.mxu3 %vm321_vm4, %v1173_v59 }
 0xae7   :  { %v1890_v40 = vpop.eup %1889  ;;  %1342 = vmatpush.msra.mxu3 %v1729_v7 }
 0xae8   :  { %v1174_v29 = vmul.f32 %v1890_v40, %v1880_v22  ;;  %v1892_v0 = vpop.eup %1891 }
 0xae9   :  { %v1150_v1 = vsel %vm321_vm4, %v1892_v0, 0.0  ;;  %v1894_v2 = vpop.eup %1893 }
 0xaea   :  { %v1162_v3 = vsel %vm321_vm4, %v1894_v2, 0.0 }
 0xaee   :  { %1765 = vmatmul.msk.f32.gmra.mxu3 %vm321_vm4, %v1174_v29  ;;  %v1451_v29 = vperm.slane %v2312_v21, 1 }
 0xafc   :  { %1151 = vadd.xlane.f32.xlu2 %v1150_v1 }
 0xb04   :  { %1163 = vadd.xlane.f32.xlu0 %v1162_v3 }
 0xb18   :  { %1830 = vrot.lane.b32.xlu0 %v1829_v4, %s1923_s27 }
 0xb2e   :  { %v1161_v5 = vpop.xlane.xlu2 %1160 }
 0xb2f   :  { %1895 = vrcp.f32 %v1161_v5 }
 0xb30   :  { %1897 = vpow2.f32 %v1135_v8 }
 0xb35   :  { %v1896_v55 = vpop.eup %1895 }
 0xb36   :  { %v1821_v9 = vpop.permute.xlu2 %1820  ;;  %v1179_v10 = vmul.f32 %v1896_v55, %v1882_v37  ;;  %v1898_v11 = vpop.eup %1897 }
 0xb37   :  { %v1822_v42 = vunpack.i.l.bf16 %v1821_v9  ;;  %v1823_v45 = vunpack.i.h.bf16 %v1821_v9  ;;  %v1156_v46 = vsel %vm321_vm4, %v1898_v11, 0.0 }
 0xb38   :  { %v1155_v36 = vpop.xlane.xlu1 %1154 }
 0xb39   :  { %1312 = vmatpush.msra.mxu2 %v1822_v42  ;;  %v1149_v30 = vpop.xlane.xlu0 %1148 }
 0xb3a   :  { %1899 = vrcp.f32 %v1149_v30 }
 0xb3b   :  { %1313 = vmatpush.msra.mxu2 %v1823_v45 }
 0xb3c   :  { %1770 = vmatmul.msk.f32.vlgmr.msra.gmra.mxu2 %vm321_vm4, %v1179_v10 }
 0xb3d   :  { %1429 = vmatpush.msrb.mxu2 %v1732_v47 }
 0xb40   :  { %v1900_v13 = vpop.eup %1899 }
 0xb41   :  { %v1175_v16 = vmul.f32 %v1900_v13, %v2416_v26 }
 0xb42   :  { %1157 = vadd.xlane.f32.xlu0 %v1156_v46 }
 0xb4c   :  { %v1826_v12 = vpop.permute.xlu0 %1825 }
 0xb4d   :  { %v1827_v14 = vunpack.i.l.bf16 %v1826_v12  ;;  %v1828_v15 = vunpack.i.h.bf16 %v1826_v12 }
 0xb4f   :  { %1242 = vmatpush.msra.mxu0 %v1827_v14 }
 0xb51   :  { %1243 = vmatpush.msra.mxu0 %v1828_v15 }
 0xb52   :  { %1766 = vmatmul.msk.f32.vlgmr.msra.gmra.mxu0 %vm321_vm4, %v1175_v16 }
 0xb53   :  { %1371 = vmatpush.msrb.mxu0 %v1730_v48 }
 0xb69   :  { %v1210_v17 = vpop.f32.mrf.mxu3 }
 0xb6a   :  { %1772 = vmatmul.msk.f32.vlgmr.msra.gmra.mxu3 %vm168_vm3, %v1210_v17 }
 0xb6f   :  { %v1152_v19 = vpop.xlane.xlu2 %1151 }
 0xb70   :  { %1901 = vrcp.f32 %v1152_v19 }
 0xb71   :  { %v1213_v22 = vpop.f32.mrf.mxu3 }
 0xb72   :  { %1773 = vmatmul.msk.f32.gmra.mxu3 %vm168_vm3, %v1213_v22 }
 0xb76   :  { %v1902_v63 = vpop.eup %1901 }
 0xb77   :  { %v1164_v23 = vpop.xlane.xlu0 %1163  ;;  %v1176_v25 = vmul.f32 %v1902_v63, %v1892_v0 }
 0xb78   :  { %1903 = vrcp.f32 %v1164_v23 }
 0xb79   :  { %1767 = vmatmul.msk.f32.gmra.mxu0 %vm321_vm4, %v1176_v25  ;;  %1905 = vrcp.f32 %v1155_v36  ;;  %v1734_v36 = vld [vmem:[%s2568_s6 + $0x28] sm:$0xff] }
 0xb7e   :  { %v1904_v31 = vpop.eup %1903 }
 0xb7f   :  { %v1180_v35 = vmul.f32 %v1904_v31, %v1894_v2  ;;  %v1906_v38 = vpop.eup %1905  ;;  %v1736_v31 = vld [vmem:[%s2568_s6 + $0x38] sm:$0xff] }
 0xb80   :  { %v1177_v43 = vmul.f32 %v1906_v38, %v2414_v24  ;;  %1530 = vmatpush.msrb.mxu3 %v1736_v31  ;;  %v1733_v38 = vld [vmem:[%s2568_s6 + $0x20] sm:$0xff] }
 0xb81   :  { %1771 = vmatmul.msk.f32.gmra.mxu2 %vm321_vm4, %v1180_v35  ;;  %v1735_v35 = vld [vmem:[%s2568_s6 + $0x30] sm:$0xff] }
 0xb82   :  { %1531 = vmatpush.msrb.mxu3 %v1735_v35 }
 0xb84   :  { %1532 = vmatpush.msrb.mxu3 %v1734_v36 }
 0xb86   :  { %1533 = vmatpush.msrb.mxu3 %v1733_v38 }
 0xb8a   :  { %v1831_v37 = vpop.permute.xlu0 %1830 }
 0xb8b   :  { %v1832_v32 = vunpack.i.l.bf16 %v1831_v37  ;;  %v1833_v41 = vunpack.i.h.bf16 %v1831_v37 }
 0xb8d   :  { %1277 = vmatpush.msra.mxu1 %v1832_v32 }
 0xb8f   :  { %1278 = vmatpush.msra.mxu1 %v1833_v41 }
 0xb90   :  { %1768 = vmatmul.msk.f32.vlgmr.msra.gmra.mxu1 %vm321_vm4, %v1177_v43 }
 0xb91   :  { %1400 = vmatpush.msrb.mxu1 %v1731_v51 }
 0xbb5   :  { %v1158_v26 = vpop.xlane.xlu0 %1157 }
 0xbb6   :  { %1907 = vrcp.f32 %v1158_v26  ;;  %v1744_v26 = vld [vmem:[%s2569_s7 + $0x78] sm:$0xff] }
 0xbb7   :  { %1558 = vmatpush.msra.mxu0 %v1744_v26 }
 0xbbc   :  { %v1908_v49 = vpop.eup %1907 }
 0xbbd   :  { %v1178_v50 = vmul.f32 %v1908_v49, %v1898_v11  ;;  %v1743_v49 = vld [vmem:[%s2569_s7 + $0x70] sm:$0xff] }
 0xbbe   :  { %1559 = vmatpush.msra.mxu0 %v1743_v49 }
 0xbbf   :  { %1769 = vmatmul.msk.f32.gmra.mxu1 %vm321_vm4, %v1178_v50  ;;  %v1315_v24 = vpop.f32.mrf.mxu2  ;;  %v1742_v50 = vld [vmem:[%s2569_s7 + $0x68] sm:$0xff] }
 0xbc0   :  { %1778 = vmatmul.msk.f32.vlgmr.msrb.gmra.mxu2 %vm168_vm3, %v1315_v24  ;;  %1560 = vmatpush.msra.mxu0 %v1742_v50 }
 0xbcf   :  { %v1245_v33 = vpop.f32.mrf.mxu0 }
 0xbd0   :  { %1774 = vmatmul.msk.f32.vlgmr.msrb.gmra.mxu0 %vm168_vm3, %v1245_v33 }
 0xbed   :  { %v1344_v56 = vpop.f32.mrf.mxu3 }
 0xbee   :  { %v1437_v58 = vsel %vm120_vm2, %v1344_v56, 0.0 }
 0xbf5   :  { %v1347_v4 = vpop.f32.mrf.mxu3 }
 0xbf6   :  { %v1248_v52 = vpop.f32.mrf.mxu0  ;;  %v1444_v6 = vsel %vm120_vm2, %v1347_v4, 0.0  ;;  %v1737_v4 = vld [vmem:[%s2569_s7 + $0x40] sm:$0xff] }
 0xbf7   :  { %1775 = vmatmul.msk.f32.gmra.mxu0 %vm168_vm3, %v1248_v52  ;;  %v1741_v52 = vld [vmem:[%s2569_s7 + $0x60] sm:$0xff] }
 0xbf8   :  { %1561 = vmatpush.msra.mxu0 %v1741_v52  ;;  %v1648_v52 = vld [vmem:[%s2570_s9 + $0x10] sm:$0xff] }
 0xc04   :  { %v1318_v53 = vpop.f32.mrf.mxu2 }
 0xc05   :  { %1779 = vmatmul.msk.f32.gmra.mxu2 %vm168_vm3, %v1318_v53 }
 0xc0d   :  { %v1280_v54 = vpop.f32.mrf.mxu1 }
 0xc0e   :  { %1776 = vmatmul.msk.f32.vlgmr.msrb.gmra.mxu1 %vm168_vm3, %v1280_v54 }
 0xc3c   :  { %v1283_v39 = vpop.f32.mrf.mxu1 }
 0xc3d   :  { %1777 = vmatmul.msk.f32.gmra.mxu1 %vm168_vm3, %v1283_v39  ;;  %v1740_v39 = vld [vmem:[%s2569_s7 + $0x58] sm:$0xff] }
 0xc3e   :  { %1562 = vmatpush.msra.mxu0 %v1740_v39 }
 0xc43   :  { %v1431_v59 = vpop.f32.mrf.mxu2 }
 0xc44   :  { %v1442_v61 = vsel %vm120_vm2, %v1431_v59, 0.0 }
 0xc4d   :  { %v1373_v44 = vpop.f32.mrf.mxu0 }
 0xc4e   :  { %v1438_v57 = vsel %vm120_vm2, %v1373_v44, 0.0 }
 0xc4f   :  { %v1439_v28 = vadd.f32 %v1438_v57, %v1437_v58 }
 0xc74   :  { %v1376_v3 = vpop.f32.mrf.mxu0 }
 0xc75   :  { %v1445_v5 = vsel %vm120_vm2, %v1376_v3, 0.0  ;;  %v1738_v3 = vld [vmem:[%s2569_s7 + $0x48] sm:$0xff] }
 0xc76   :  { %v1446_v8 = vadd.f32 %v1445_v5, %v1444_v6  ;;  %v1511_v5 = vperm.slane %v2312_v21, 2 }
 0xc88   :  { %v1434_v9 = vpop.f32.mrf.mxu2 }
 0xc89   :  { %v1449_v10 = vsel %vm120_vm2, %v1434_v9, 0.0 }
 0xc8b   :  { %v1402_v40 = vpop.f32.mrf.mxu1 }
 0xc8c   :  { %v1440_v27 = vsel %vm120_vm2, %v1402_v40, 0.0 }
 0xc8d   :  { %v1441_v60 = vadd.f32 %v1440_v27, %v1439_v28 }
 0xc8f   :  { %v1443_v62 = vadd.f32 %v1442_v61, %v1441_v60 }
 0xc91   :  { %v1452_v0 = vadd.f32 %v1451_v29, %v1443_v62 }
 0xc93   :  { %v1454_v1 = vadd.f32 %v1452_v0, %v2301_v18 }
 0xc95   :  { %v1456_v2 = vsel %vm120_vm2, %v1454_v1, 0.0 }
 0xc96   :  { %1457 = vadd.xlane.f32.xlu1 %v1456_v2  ;;  %v1739_v2 = vld [vmem:[%s2569_s7 + $0x50] sm:$0xff] }
 0xc97   :  { %1563 = vmatpush.msra.mxu0 %v1739_v2 }
 0xc99   :  { %1564 = vmatpush.msra.mxu0 %v1738_v3 }
 0xc9b   :  { %1565 = vmatpush.msra.mxu0 %v1737_v4 }
 0xcba   :  { %v1405_v55 = vpop.f32.mrf.mxu1 }
 0xcbb   :  { %v1447_v42 = vsel %vm120_vm2, %v1405_v55, 0.0 }
 0xcbc   :  { %v1448_v45 = vadd.f32 %v1447_v42, %v1446_v8 }
 0xcbe   :  { %v1450_v11 = vadd.f32 %v1449_v10, %v1448_v45  ;;  %v1543_v10 = vperm.slane %v2312_v21, 3 }
 0xcc0   :  { %v1453_v46 = vadd.f32 %v1451_v29, %v1450_v11 }
 0xcc2   :  { %v1455_v18 = vadd.f32 %v1453_v46, %v2305_v20 }
 0xcc4   :  { %v1459_v30 = vsel %vm120_vm2, %v1455_v18, 0.0 }
 0xcc5   :  { %1460 = vadd.xlane.f32.xlu2 %v1459_v30 }
 0xd09   :  { %v1458_v7 = vpop.xlane.xlu1 %1457 }
 0xd0a   :  { %v1462_v12 = vmul.f32 %v1458_v7, %v2227_v34 }
 0xd0c   :  { %v1464_v13 = vsub.f32 %v1454_v1, %v1462_v12 }
 0xd0e   :  { %v1466_v14 = vmul.f32 %v1464_v13, %v1464_v13 }
 0xd10   :  { %v1468_v15 = vsel %vm120_vm2, %v1466_v14, 0.0 }
 0xd11   :  { %1469 = vadd.xlane.f32.xlu1 %v1468_v15 }
 0xd2a   :  { %1501 = vrot.lane.b32.xlu1 %v1451_v29, %s1921_s25 }
 0xd38   :  { %v1461_v16 = vpop.xlane.xlu2 %1460 }
 0xd39   :  { %v1463_v17 = vmul.f32 %v1461_v16, %v2227_v34 }
 0xd3b   :  { %v1465_v19 = vsub.f32 %v1455_v18, %v1463_v17 }
 0xd3d   :  { %v1467_v22 = vmul.f32 %v1465_v19, %v1465_v19 }
 0xd3f   :  { %v1471_v20 = vsel %vm120_vm2, %v1467_v22, 0.0 }
 0xd40   :  { %1472 = vadd.xlane.f32.xlu2 %v1471_v20 }
 0xd58   :  { %1506 = vrot.lane.b32.xlu2 %v1451_v29, %s1923_s27 }
 0xd84   :  { %v1470_v63 = vpop.xlane.xlu1 %1469 }
 0xd85   :  { %v1474_v23 = vmul.f32 %v1470_v63, %v2227_v34 }
 0xd87   :  { %v1476_v25 = vadd.f32 1e-05, %v1474_v23 }
 0xd89   :  { %1909 = vrsqrt.f32 %v1476_v25  ;;  %vm1484_vm4 = vweird.f32 %v1476_v25 }
 0xd8f   :  { %v1910_v37 = vpop.eup %1909 }
 0xd90   :  { %v1479_v32 = vmul.f32 %v1910_v37, %v1476_v25  ;;  %vm1485_vm3 = vweird.f32 %v1910_v37 }
 0xd91   :  { %vm1486_vm6 = vmor %vm1484_vm4, %vm1485_vm3 }
 0xd92   :  { %v1480_v41 = vmul.f32 %v1910_v37, %v1479_v32 }
 0xd94   :  { %v1481_v43 = vmul.f32 0.5, %v1480_v41 }
 0xd96   :  { %v1482_v47 = vsub.f32 1.5, %v1481_v43 }
 0xd98   :  { %v1483_v48 = vmul.f32 %v1910_v37, %v1482_v47 }
 0xd9a   :  { %v1487_v24 = vsel %vm1486_vm6, %v1910_v37, %v1483_v48 }
 0xd9b   :  { %v1498_v53 = vmul.f32 %v1487_v24, %v1464_v13  ;;  %v1649_v24 = vld [vmem:[%s2570_s9 + $0x18] sm:$0xff] }
 0xd9c   :  { %v1502_v44 = vpop.permute.xlu1 %1501  ;;  %1669 = vmatpush.msra.mxu1 %v1649_v24 }
 0xd9d   :  { %v1504_v56 = vmul.f32 %v1502_v44, %v1498_v53  ;;  %v1646_v53 = vld [vmem:[%s2570_s9] sm:$0xff] }
 0xd9e   :  { %1670 = vmatpush.msra.mxu1 %v1648_v52 }
 0xdb3   :  { %v1473_v33 = vpop.xlane.xlu2 %1472 }
 0xdb4   :  { %v1475_v51 = vmul.f32 %v1473_v33, %v2227_v34 }
 0xdb6   :  { %v1477_v54 = vadd.f32 1e-05, %v1475_v51 }
 0xdb8   :  { %1911 = vrsqrt.f32 %v1477_v54  ;;  %vm1494_vm8 = vweird.f32 %v1477_v54 }
 0xdbb   :  { %v1507_v57 = vpop.permute.xlu2 %1506 }
 0xdbc   :  { %v1509_v58 = vadd.f32 %v1507_v57, %v1504_v56  ;;  %v16_v56 = vstv %s2571_s10 }
 0xdbd   :  { %17 = vst [vmem:[#allocation2] sm:$0x1] %v16_v56 }
 0xdbe   :  { %v1912_v59 = vpop.eup %1911  ;;  %1780 = vmatmul.msk.f32.vlgmr.msrb.gmra.mxu3 %vm120_vm2, %v1509_v58 }
 0xdbf   :  { %v1489_v28 = vmul.f32 %v1912_v59, %v1477_v54  ;;  %vm1495_vm7 = vweird.f32 %v1912_v59 }
 0xdc0   :  { %vm1496_vm9 = vmor %vm1494_vm8, %vm1495_vm7 }
 0xdc1   :  { %v1490_v40 = vmul.f32 %v1912_v59, %v1489_v28 }
 0xdc3   :  { %v1491_v27 = vmul.f32 0.5, %v1490_v40 }
 0xdc5   :  { %v1492_v29 = vsub.f32 1.5, %v1491_v27 }
 0xdc7   :  { %v1493_v60 = vmul.f32 %v1912_v59, %v1492_v29 }
 0xdc9   :  { %v1497_v61 = vsel %vm1496_vm9, %v1912_v59, %v1493_v60 }
 0xdca   :  { %v1499_v62 = vmul.f32 %v1497_v61, %v1465_v19 }
 0xdcc   :  { %v1505_v0 = vmul.f32 %v1502_v44, %v1499_v62 }
 0xdce   :  { %v1510_v1 = vadd.f32 %v1507_v57, %v1505_v0 }
 0xdd0   :  { %1781 = vmatmul.msk.f32.gmra.mxu3 %vm120_vm2, %v1510_v1 }
 0xe41   :  { %v1535_v6 = vpop.f32.mrf.mxu3 }
 0xe42   :  { %v1536_v8 = vadd.f32 %v1535_v6, %v1511_v5 }
 0xe44   :  { %v1541_v9 = vmax.f32 %v1536_v8, 0.0 }
 0xe46   :  { %1782 = vmatmul.msk.f32.vlgmr.msra.gmra.mxu0 %vm780_vm12, %v1541_v9 }
 0xe53   :  { %v1538_v55 = vpop.f32.mrf.mxu3 }
 0xe54   :  { %v1539_v42 = vadd.f32 %v1538_v55, %v1511_v5 }
 0xe56   :  { %v1542_v45 = vmax.f32 %v1539_v42, 0.0 }
 0xe58   :  { %1783 = vmatmul.msk.f32.gmra.mxu0 %vm780_vm12, %v1542_v45 }
 0xec3   :  { %v1567_v11 = vpop.f32.mrf.mxu0 }
 0xec4   :  { %v1568_v46 = vadd.f32 %v1567_v11, %v1543_v10 }
 0xec6   :  { %v1573_v18 = vadd.f32 %v1568_v46, %v1509_v58 }
 0xec8   :  { %v1575_v30 = vsel %vm120_vm2, %v1573_v18, 0.0 }
 0xec9   :  { %1576 = vadd.xlane.f32.xlu0 %v1575_v30 }
 0xed5   :  { %v1570_v7 = vpop.f32.mrf.mxu0 }
 0xed6   :  { %v1571_v12 = vadd.f32 %v1570_v7, %v1543_v10 }
 0xed8   :  { %v1574_v13 = vadd.f32 %v1571_v12, %v1510_v1 }
 0xeda   :  { %v1578_v14 = vsel %vm120_vm2, %v1574_v13, 0.0 }
 0xedb   :  { %1579 = vadd.xlane.f32.xlu0 %v1578_v14 }
 0xeef   :  { %1620 = vrot.lane.b32.xlu0 %v1543_v10, %s1921_s25 }
 0xef7   :  { %1625 = vrot.lane.b32.xlu0 %v1543_v10, %s1923_s27 }
 0xf3c   :  { %v1577_v15 = vpop.xlane.xlu0 %1576 }
 0xf3d   :  { %v1581_v16 = vmul.f32 %v1577_v15, %v2227_v34 }
 0xf3f   :  { %v1583_v21 = vsub.f32 %v1573_v18, %v1581_v16  ;;  %v1834_v18 = vld [vmem:[#allocation2] ss:$0 sm:$0xff] }
 0xf41   :  { %v1585_v17 = vmul.f32 %v1583_v21, %v1583_v21 }
 0xf43   :  { %v1587_v19 = vsel %vm120_vm2, %v1585_v17, 0.0 }
 0xf44   :  { %1588 = vadd.xlane.f32.xlu1 %v1587_v19 }
 0xf4e   :  { %v1580_v22 = vpop.xlane.xlu0 %1579 }
 0xf4f   :  { %v1582_v20 = vmul.f32 %v1580_v22, %v2227_v34 }
 0xf51   :  { %v1584_v63 = vsub.f32 %v1574_v13, %v1582_v20 }
 0xf53   :  { %v1586_v23 = vmul.f32 %v1584_v63, %v1584_v63 }
 0xf55   :  { %v1590_v25 = vsel %vm120_vm2, %v1586_v23, 0.0 }
 0xf56   :  { %1591 = vadd.xlane.f32.xlu2 %v1590_v25 }
 0xf61   :  { %v1621_v48 = vpop.permute.xlu0 %1620 }
 0xf69   :  { %v1626_v39 = vpop.permute.xlu0 %1625 }
 0xfb7   :  { %v1589_v31 = vpop.xlane.xlu1 %1588 }
 0xfb8   :  { %v1593_v35 = vmul.f32 %v1589_v31, %v2227_v34 }
 0xfba   :  { %v1595_v36 = vadd.f32 1e-05, %v1593_v35 }
 0xfbc   :  { %1913 = vrsqrt.f32 %v1595_v36  ;;  %vm1603_vm11 = vweird.f32 %v1595_v36 }
 0xfc2   :  { %v1914_v37 = vpop.eup %1913 }
 0xfc3   :  { %v1598_v38 = vmul.f32 %v1914_v37, %v1595_v36  ;;  %vm1604_vm10 = vweird.f32 %v1914_v37 }
 0xfc4   :  { %vm1605_vm12 = vmor %vm1603_vm11, %vm1604_vm10 }
 0xfc5   :  { %v1599_v32 = vmul.f32 %v1914_v37, %v1598_v38 }
 0xfc7   :  { %v1600_v41 = vmul.f32 0.5, %v1599_v32 }
 0xfc9   :  { %v1601_v43 = vsub.f32 1.5, %v1600_v41  ;;  %v1592_v47 = vpop.xlane.xlu2 %1591 }
 0xfca   :  { %v1594_v26 = vmul.f32 %v1592_v47, %v2227_v34  ;;  %v1647_v34 = vld [vmem:[%s2570_s9 + $0x8] sm:$0xff] }
 0xfcb   :  { %v1602_v49 = vmul.f32 %v1914_v37, %v1601_v43  ;;  %1671 = vmatpush.msra.mxu1 %v1647_v34 }
 0xfcc   :  { %v1596_v50 = vadd.f32 1e-05, %v1594_v26 }
 0xfcd   :  { %v1606_v33 = vsel %vm1605_vm12, %v1914_v37, %v1602_v49  ;;  %1672 = vmatpush.msra.mxu1 %v1646_v53 }
 0xfce   :  { %1915 = vrsqrt.f32 %v1596_v50  ;;  %v1617_v51 = vmul.f32 %v1606_v33, %v1583_v21  ;;  %vm1613_vm14 = vweird.f32 %v1596_v50 }
 0xfd0   :  { %v1623_v54 = vmul.f32 %v1621_v48, %v1617_v51 }
 0xfd2   :  { %v1628_v58 = vadd.f32 %v1626_v39, %v1623_v54 }
 0xfd4   :  { %v1916_v44 = vpop.eup %1915  ;;  %v1630_v40 = vsel %vm120_vm2, %v1628_v58, -inf }
 0xfd5   :  { %v1608_v57 = vmul.f32 %v1916_v44, %v1596_v50  ;;  %vm1614_vm13 = vweird.f32 %v1916_v44  ;;  %v1631_v60 = vrot.slane %v1630_v40, 4 }
 0xfd6   :  { %vm1615_vm15 = vmor %vm1613_vm14, %vm1614_vm13 }
 0xfd7   :  { %v1609_v59 = vmul.f32 %v1916_v44, %v1608_v57  ;;  %v1632_v0 = vmax.f32 %v1630_v40, %v1631_v60 }
 0xfd9   :  { %v1610_v28 = vmul.f32 0.5, %v1609_v59  ;;  %v1633_v3 = vrot.slane %v1632_v0, 2 }
 0xfdb   :  { %v1611_v27 = vsub.f32 1.5, %v1610_v28  ;;  %v1634_v6 = vmax.f32 %v1632_v0, %v1633_v3 }
 0xfdd   :  { %v1612_v29 = vmul.f32 %v1916_v44, %v1611_v27  ;;  %v1635_v55 = vrot.slane %v1634_v6, 1 }
 0xfdf   :  { %v1616_v61 = vsel %vm1615_vm15, %v1916_v44, %v1612_v29  ;;  %v1636_v10 = vmax.f32 %v1634_v6, %v1635_v55 }
 0xfe0   :  { %v1618_v62 = vmul.f32 %v1616_v61, %v1584_v63 }
 0xfe2   :  { %v1624_v1 = vmul.f32 %v1621_v48, %v1618_v62 }
 0xfe4   :  { %v1629_v2 = vadd.f32 %v1626_v39, %v1624_v1 }
 0xfe6   :  { %v1637_v4 = vsel %vm120_vm2, %v1629_v2, -inf }
 0xfe7   :  { %v1638_v5 = vrot.slane %v1637_v4, 4 }
 0xfe9   :  { %v1639_v8 = vmax.f32 %v1637_v4, %v1638_v5 }
 0xfeb   :  { %v1640_v9 = vrot.slane %v1639_v8, 2 }
 0xfed   :  { %v1641_v42 = vmax.f32 %v1639_v8, %v1640_v9 }
 0xfef   :  { %v1642_v45 = vrot.slane %v1641_v42, 1 }
 0xff1   :  { %v1643_v11 = vmax.f32 %v1641_v42, %v1642_v45 }
 0xff3   :  { %v1645_v46 = vsel %vm1644_vm0, %v1636_v10, %v1643_v11 }
 0xff4   :  { %1784 = vmatmul.msk.f32.vlgmr.msra.gmra.mxu1 %vm120_vm2, %v1645_v46 }
0x1071   :  { %v1674_v30 = vpop.f32.mrf.mxu1 }
0x1072   :  { %v1675_v7 = vadd.f32 %v1834_v18, %v1674_v30 }
0x1074   :  { %1678 = vst.msk [vmem:[%s2572_s11] sm:$0x3] %vm1677_vm1, %v1675_v7 }

</bundles_post_ra>
